<compile_context>
chip_gen: v6e
topology: v6e:2x2x1
jax: 0.10.0
libtpu: 0.0.40
codegen_flags: <defaults>
</compile_context>

<pallas_src>
import math

import jax
import jax.numpy as jnp
from jax.experimental import pallas as pl
from jax.experimental.pallas import tpu as pltpu


def token_embed_kernel(x_ref, w_ref, o_ref):
    # x_ref: (Bt, L, C)   w_ref: (3, C, D)   o_ref: (Bt, L, D)
    x = x_ref[...]
    bt, L, C = x.shape
    D = o_ref.shape[-1]

    # Circular shifts along the sequence axis, per batch (axis=1 of the 3-D
    # block).  XLU sublane rotations; negative shift expressed as L-1.
    x_prev = pltpu.roll(x, 1, axis=1)        # x[b, (l-1) % L]
    x_next = pltpu.roll(x, L - 1, axis=1)    # x[b, (l+1) % L]

    # Collapse (Bt, L) -> M rows for plain rank-2 MXU matmuls (layout-free
    # when L % 8 == 0).  Three dots accumulated in f32; MXU K is tiny, so the
    # extra pushes are free versus building a lane-concatenated x_cat.
    xm = x.reshape(bt * L, C)
    xp = x_prev.reshape(bt * L, C)
    xn = x_next.reshape(bt * L, C)

    y = jnp.dot(xp, w_ref[0], preferred_element_type=jnp.float32)
    y = y + jnp.dot(xm, w_ref[1], preferred_element_type=jnp.float32)
    y = y + jnp.dot(xn, w_ref[2], preferred_element_type=jnp.float32)

    o_ref[...] = y.reshape(bt, L, D).astype(o_ref.dtype)


def _cdiv(a, b):
    return -(-a // b)


def _round_up(n, m):
    return ((n + m - 1) // m) * m


def _tpu_generation_info():
    """Return (vmem_capacity_bytes, num_tensorcores) with safe fallbacks."""
    vmem_cap = 128 << 20
    try:
        info = pltpu.get_tpu_info()
        vmem_cap = int(getattr(info, "vmem_capacity_bytes", vmem_cap))
    except Exception:
        pass
    kind = ""
    try:
        kind = jax.devices()[0].device_kind.lower()
    except Exception:
        pass
    # v7x: 2 TensorCores per chip, only 64 MiB VMEM per TC.
    num_tc = 2 if ("7" in kind or vmem_cap <= (64 << 20)) else 1
    return vmem_cap, num_tc


def _tile_plan(B, L, C, D, itemsize):
    """Pick (Bt, steps, vmem_limit_bytes), generation-aware."""
    vmem_cap, num_tc = _tpu_generation_info()
    # Per-step working set budget (double-buffered in/out + in-kernel temps),
    # leaving headroom for compiler scratch.  ~48 MiB on 128-MiB chips,
    # ~38 MiB on 64-MiB v7x.
    budget = min(48 << 20, int(vmem_cap * 0.6))
    vmem_limit = int(min(vmem_cap * 0.75, budget + (16 << 20)))

    Ls = _round_up(L, 8)
    Cp = _round_up(C, 128)  # channel dim is lane-padded in VMEM
    Dp = _round_up(D, 128)

    def vmem_bytes(bt):
        io = 2 * bt * Ls * (Cp + Dp) * itemsize        # double-buffered x / out tiles
        wgt = 2 * 3 * _round_up(C, 8) * Dp * itemsize  # resident weight (tiny)
        tmp = bt * Ls * (3 * Cp + 2 * Dp) * 4          # rolled copies + f32 accumulator
        return io + wgt + tmp

    bt_max = 1
    for bt in range(1, B + 1):
        if vmem_bytes(bt) <= budget:
            bt_max = bt
        else:
            break

    min_steps = _cdiv(B, bt_max)
    if num_tc > 1 and B > 1:
        # At least one block per TensorCore and an even step count so neither
        # core ends up with 2x the work.
        steps = max(min_steps, min(B, num_tc))
        steps = num_tc * _cdiv(steps, num_tc)
    else:
        # Single-TC: the grid is a serial loop; fewest, largest steps win.
        steps = min_steps

    bt = _cdiv(B, steps)
    return bt, steps, vmem_limit


def token_embedding(x, w):
    """x: (B, L, c_in); w: (3, c_in, d_model). Returns (B, L, d_model)."""
    B, L, C = x.shape
    K, C2, D = w.shape
    assert K == 3 and C2 == C

    bt, steps, vmem_limit = _tile_plan(B, L, C, D, x.dtype.itemsize)
    B_pad = bt * steps
    if B_pad != B:
        # Pad batch with zeros (conv of zeros is zero); slice the result back.
        x = jnp.pad(x, ((0, B_pad - B), (0, 0), (0, 0)))

    out = pl.pallas_call(
        token_embed_kernel,
        out_shape=jax.ShapeDtypeStruct((B_pad, L, D), x.dtype),
        grid_spec=pltpu.PrefetchScalarGridSpec(
            num_scalar_prefetch=0,
            grid=(steps,),
            in_specs=[
                # Streaming activation tiles (double-buffered by the pipeline).
                pl.BlockSpec((bt, L, C), lambda b: (b, 0, 0)),
                # Weight: constant index_map -> fetched once, stays resident
                # across grid steps (only ~3*C*D*itemsize bytes).
                pl.BlockSpec((3, C, D), lambda b: (0, 0, 0)),
            ],
            out_specs=pl.BlockSpec((bt, L, D), lambda b: (b, 0, 0)),
        ),
        compiler_params=pltpu.CompilerParams(
            # Batch-step axis shards across the 2 TCs on v7x; no-op on 1-TC chips.
            dimension_semantics=("parallel",),
            vmem_limit_bytes=vmem_limit,
        ),
    )(x, w)
    return out[:B] if B_pad != B else out


if __name__ == "__main__":
    # Small but lane-friendly shapes: D = 128 keeps output stores lane-dense,
    # L multiple of 8 keeps the in-kernel reshape layout-free.
    B, L, C, D = 8, 64, 4, 128

    key = jax.random.PRNGKey(0)
    kx, kw = jax.random.split(key)

    x = jax.random.normal(kx, (B, L, C), dtype=jnp.float32)

    # Deterministic kaiming_normal_(mode='fan_in', nonlinearity='leaky_relu')
    # on the Conv1d weight (d_model, c_in, 3): fan_in = c_in*3, gain = sqrt(2).
    fan_in = C * 3
    gain = math.sqrt(2.0)
    std = gain / math.sqrt(fan_in)
    w_pt = std * jax.random.normal(kw, (D, C, 3), dtype=jnp.float32)  # PyTorch layout
    w = jnp.transpose(w_pt, (2, 1, 0))                                # (3, c_in, d_model)

    out = token_embedding(x, w)
    jax.block_until_ready(out)

    # Pure-JAX reference of the circular-padded conv (channels-last form).
    x_prev = jnp.roll(x, 1, axis=1)
    x_next = jnp.roll(x, -1, axis=1)
    ref = x_prev @ w[0] + x @ w[1] + x_next @ w[2]

    assert out.shape == (B, L, D), out.shape
    assert jnp.allclose(out, ref, atol=1e-4, rtol=1e-4), float(jnp.max(jnp.abs(out - ref)))

    print("KERNEL_OK")
</pallas_src>

<mosaic_0001>
module attributes {stable_mosaic.version = 11 : i64} {
  func.func @token_embed_kernel(%arg0: i32, %arg1: memref<8x64x4xf32, #tpu.memory_space<vmem>>, %arg2: memref<3x4x128xf32, #tpu.memory_space<vmem>>, %arg3: memref<8x64x128xf32, #tpu.memory_space<vmem>>) attributes {dimension_semantics = [#tpu.dimension_semantics<parallel>], iteration_bounds = array<i64: 1>, scalar_prefetch = 0 : i64, scratch_operands = 0 : i64, tpu.core_type = #tpu.core_type<tc>, window_params = [{transform_indices = @transform_0, window_bounds = array<i64: 8, 64, 4>}, {pipeline_mode = #tpu.pipeline_mode<synchronous>, transform_indices = @transform_1, window_bounds = array<i64: 3, 4, 128>}, {transform_indices = @transform_2, window_bounds = array<i64: 8, 64, 128>}]} {
    %c0 = arith.constant 0 : index
    %c0_0 = arith.constant 0 : index
    %c0_1 = arith.constant 0 : index
    %0 = vector.load %arg1[%c0, %c0_0, %c0_1] : memref<8x64x4xf32, #tpu.memory_space<vmem>>, vector<8x64x4xf32>
    %c1_i32 = arith.constant 1 : i32
    %1 = tpu.dynamic_rotate %0 by %c1_i32 dim 1 : vector<8x64x4xf32>, i32 -> vector<8x64x4xf32>
    %c63_i32 = arith.constant 63 : i32
    %2 = tpu.dynamic_rotate %0 by %c63_i32 dim 1 : vector<8x64x4xf32>, i32 -> vector<8x64x4xf32>
    %3 = vector.shape_cast %0 : vector<8x64x4xf32> to vector<512x4xf32>
    %4 = vector.shape_cast %1 : vector<8x64x4xf32> to vector<512x4xf32>
    %5 = vector.shape_cast %2 : vector<8x64x4xf32> to vector<512x4xf32>
    %c0_2 = arith.constant 0 : index
    %c0_3 = arith.constant 0 : index
    %c0_4 = arith.constant 0 : index
    %6 = vector.load %arg2[%c0_2, %c0_3, %c0_4] : memref<3x4x128xf32, #tpu.memory_space<vmem>>, vector<1x4x128xf32>
    %7 = vector.shape_cast %6 : vector<1x4x128xf32> to vector<4x128xf32>
    %cst = arith.constant dense<0.000000e+00> : vector<512x128xf32>
    %8 = tpu.matmul %4, %7, %cst {dimension_numbers = #tpu.dot_dimension_numbers<[1], [0], [0], [1], [0, 0, 1, 1], [], []>} : vector<512x4xf32>, vector<4x128xf32>, vector<512x128xf32> -> vector<512x128xf32>
    %c1 = arith.constant 1 : index
    %c0_5 = arith.constant 0 : index
    %c0_6 = arith.constant 0 : index
    %9 = vector.load %arg2[%c1, %c0_5, %c0_6] : memref<3x4x128xf32, #tpu.memory_space<vmem>>, vector<1x4x128xf32>
    %10 = vector.shape_cast %9 : vector<1x4x128xf32> to vector<4x128xf32>
    %cst_7 = arith.constant dense<0.000000e+00> : vector<512x128xf32>
    %11 = tpu.matmul %3, %10, %cst_7 {dimension_numbers = #tpu.dot_dimension_numbers<[1], [0], [0], [1], [0, 0, 1, 1], [], []>} : vector<512x4xf32>, vector<4x128xf32>, vector<512x128xf32> -> vector<512x128xf32>
    %12 = arith.addf %8, %11 : vector<512x128xf32>
    %c2 = arith.constant 2 : index
    %c0_8 = arith.constant 0 : index
    %c0_9 = arith.constant 0 : index
    %13 = vector.load %arg2[%c2, %c0_8, %c0_9] : memref<3x4x128xf32, #tpu.memory_space<vmem>>, vector<1x4x128xf32>
    %14 = vector.shape_cast %13 : vector<1x4x128xf32> to vector<4x128xf32>
    %cst_10 = arith.constant dense<0.000000e+00> : vector<512x128xf32>
    %15 = tpu.matmul %5, %14, %cst_10 {dimension_numbers = #tpu.dot_dimension_numbers<[1], [0], [0], [1], [0, 0, 1, 1], [], []>} : vector<512x4xf32>, vector<4x128xf32>, vector<512x128xf32> -> vector<512x128xf32>
    %16 = arith.addf %12, %15 : vector<512x128xf32>
    %17 = vector.shape_cast %16 : vector<512x128xf32> to vector<8x64x128xf32>
    %c0_11 = arith.constant 0 : index
    %c0_12 = arith.constant 0 : index
    %c0_13 = arith.constant 0 : index
    %18 = vector.load %arg3[%c0_11, %c0_12, %c0_13] : memref<8x64x128xf32, #tpu.memory_space<vmem>>, vector<8x64x128xf32>
    tpu.vector_store %arg3[%c0_11, %c0_12, %c0_13], %17 {strides = array<i32>} : memref<8x64x128xf32, #tpu.memory_space<vmem>>, vector<8x64x128xf32>,
    return
  }
  func.func @transform_0(%arg0: i32) -> (i32, i32, i32) {
    %c0_i32 = arith.constant 0 : i32
    %c0_i32_0 = arith.constant 0 : i32
    %c0_i32_1 = arith.constant 0 : i32
    return %arg0, %c0_i32, %c0_i32_0 : i32, i32, i32
  }
  func.func @transform_1(%arg0: i32) -> (i32, i32, i32) {
    %c0_i32 = arith.constant 0 : i32
    %c0_i32_0 = arith.constant 0 : i32
    %c0_i32_1 = arith.constant 0 : i32
    %c0_i32_2 = arith.constant 0 : i32
    return %c0_i32, %c0_i32_0, %c0_i32_1 : i32, i32, i32
  }
  func.func @transform_2(%arg0: i32) -> (i32, i32, i32) {
    %c0_i32 = arith.constant 0 : i32
    %c0_i32_0 = arith.constant 0 : i32
    %c0_i32_1 = arith.constant 0 : i32
    return %arg0, %c0_i32, %c0_i32_0 : i32, i32, i32
  }
}

</mosaic_0001>

<bundles_post_ra>
// kernel: tpu_custom_call.1
= control target key start
LH: loop header
LB: loop body
LE: loop exit
PB: predicated region body
PF: predicated region fallthrough
CT: control target
= control target key end

     0   :  { %vm532_vm0 = vcmask 1043456   ;;  %vm339_vm1 = vcmask 31744   ;;  %v140_v34 = vlaneseq  ;;  %s4636_s0 = inlined_call_operand.vmem [shape: f32[8,64,4], index: 0, kind: input, shape index: {}]   ;;  %s4637_s1 = inlined_call_operand.vmem [shape: f32[3,4,128], index: 1, kind: input, shape index: {}]   ;;  %s4638_s2 = inlined_call_operand.hbm [shape: f32[8,64,128], index: 2, kind: output, shape index: {}]  }
   0x1   :  { %v2227_v0 = vld [vmem:[%s4637_s1 + $0x4] sm:$0xf]  ;;  %v2976_v3 = vld [vmem:[%s4636_s0 + $0x108] sm:$0xff]  ;;  %v336_v4 = vld [vmem:[%s4637_s1] sm:$0xf] }
   0x2   :  { %v2964_v1 = vld [vmem:[%s4636_s0 + $0x100] sm:$0xff]  ;;  %2913 = vmatprep.subr.msk.mxu1 %vm532_vm0, %v2227_v0  ;;  %2619 = vmatprep.subr.msk.mxu0 %vm532_vm0, %v2227_v0  ;;  %v2987_v5 = vld [vmem:[%s4636_s0 + $0x8] sm:$0xff]  ;;  %v2998_v7 = vld [vmem:[%s4636_s0 + $0x110] sm:$0xff]  ;;  %v3225_v48 = vshrl.u32 %v140_v34, 7 }
   0x3   :  { %v2969_v2 = vld [vmem:[%s4636_s0] sm:$0xff]  ;;  %2914 = vmatpush3.msk.msra.mxu1 %vm532_vm0, %v2227_v0  ;;  %2669 = vmatprep.mubr.msk.f32.mxu1 %vm339_vm1, %v2964_v1  ;;  %v2358_v6 = vld [vmem:[%s4637_s1 + $0x8] sm:$0xf]  ;;  %v3006_v8 = vld [vmem:[%s4636_s0 + $0x10] sm:$0xff] }
   0x4   :  { %2620 = vmatpush3.msk.msra.mxu0 %vm532_vm0, %v2227_v0  ;;  %2621 = vmatprep.mubr.msk.f32.mxu0 %vm339_vm1, %v2969_v2  ;;  %v3014_v9 = vld [vmem:[%s4636_s0 + $0x118] sm:$0xff]  ;;  %v3027_v11 = vld [vmem:[%s4636_s0 + $0x120] sm:$0xff]  ;;  %v3046_v13 = vld [vmem:[%s4636_s0 + $0x128] sm:$0xff]  ;;  %v76_v39 = vrot.slane %v2969_v2, 7 }
   0x5   :  { %2670 = vmatmul.mubr.msk.f32.vlgmr.msra.gmra.mxu1 %vm339_vm1, %v2976_v3  ;;  %2717 = vmatprep.subr.msk.mxu1 %vm532_vm0, %v336_v4  ;;  %v3022_v10 = vld [vmem:[%s4636_s0 + $0x18] sm:$0xff]  ;;  %v3035_v12 = vld [vmem:[%s4636_s0 + $0x20] sm:$0xff]  ;;  %v3053_v14 = vld [vmem:[%s4636_s0 + $0x28] sm:$0xff] }
   0x6   :  { %2622 = vmatmul.mubr.msk.f32.vlgmr.msra.gmra.mxu0 %vm339_vm1, %v2987_v5  ;;  %2718 = vmatpush3.msk.msra.mxu1 %vm532_vm0, %v336_v4  ;;  %v3058_v15 = vld [vmem:[%s4636_s0 + $0x130] sm:$0xff]  ;;  %v3074_v17 = vld [vmem:[%s4636_s0 + $0x138] sm:$0xff]  ;;  %v3086_v19 = vld [vmem:[%s4636_s0 + $0x140] sm:$0xff] }
   0x7   :  { %2815 = vmatprep.subr.msk.mxu0 %vm532_vm0, %v2358_v6  ;;  %2672 = vmatprep.mubr.msk.f32.mxu1 %vm339_vm1, %v2998_v7  ;;  %v3063_v16 = vld [vmem:[%s4636_s0 + $0x30] sm:$0xff]  ;;  %v3081_v18 = vld [vmem:[%s4636_s0 + $0x38] sm:$0xff]  ;;  %v3091_v20 = vld [vmem:[%s4636_s0 + $0x40] sm:$0xff] }
   0x8   :  { %2816 = vmatpush3.msk.msra.mxu0 %vm532_vm0, %v2358_v6  ;;  %2624 = vmatprep.mubr.msk.f32.mxu0 %vm339_vm1, %v3006_v8  ;;  %v3102_v21 = vld [vmem:[%s4636_s0 + $0x148] sm:$0xff]  ;;  %v3114_v23 = vld [vmem:[%s4636_s0 + $0x150] sm:$0xff]  ;;  %v3130_v25 = vld [vmem:[%s4636_s0 + $0x158] sm:$0xff] }
   0x9   :  { %2673 = vmatmul.mubr.msk.f32.gmra.mxu1 %vm339_vm1, %v3014_v9  ;;  %v3109_v22 = vld [vmem:[%s4636_s0 + $0x48] sm:$0xff]  ;;  %v3119_v24 = vld [vmem:[%s4636_s0 + $0x50] sm:$0xff]  ;;  %v3137_v26 = vld [vmem:[%s4636_s0 + $0x58] sm:$0xff] }
   0xa   :  { %2625 = vmatmul.mubr.msk.f32.gmra.mxu0 %vm339_vm1, %v3022_v10  ;;  %2675 = vmatprep.mubr.msk.f32.mxu1 %vm339_vm1, %v3027_v11  ;;  %v3142_v27 = vld [vmem:[%s4636_s0 + $0x160] sm:$0xff]  ;;  %v3158_v29 = vld [vmem:[%s4636_s0 + $0x168] sm:$0xff]  ;;  %v3170_v31 = vld [vmem:[%s4636_s0 + $0x170] sm:$0xff] }
   0xb   :  { %2627 = vmatprep.mubr.msk.f32.mxu0 %vm339_vm1, %v3035_v12  ;;  %v3147_v28 = vld [vmem:[%s4636_s0 + $0x60] sm:$0xff]  ;;  %v3165_v30 = vld [vmem:[%s4636_s0 + $0x68] sm:$0xff]  ;;  %v3175_v32 = vld [vmem:[%s4636_s0 + $0x70] sm:$0xff] }
   0xc   :  { %4660 = vst [vmem:[#allocation5_spill] sm:$0xff] %v3175_v32  ;;  %v3186_v33 = vld [vmem:[%s4636_s0 + $0x178] sm:$0xff]  ;;  %v3198_v36 = vld [vmem:[%s4636_s0 + $0x180] sm:$0xff]  ;;  %v3223_v47 = vld [vmem:[%s4636_s0 + $0x188] sm:$0xff] }
   0xd   :  { %2676 = vmatmul.mubr.msk.f32.gmra.mxu1 %vm339_vm1, %v3046_v13  ;;  %v3193_v35 = vld [vmem:[%s4636_s0 + $0x78] sm:$0xff]  ;;  %v3206_v40 = vld [vmem:[%s4636_s0 + $0x80] sm:$0xff] }
   0xe   :  { %2628 = vmatmul.mubr.msk.f32.gmra.mxu0 %vm339_vm1, %v3053_v14  ;;  %2678 = vmatprep.mubr.msk.f32.mxu1 %vm339_vm1, %v3058_v15  ;;  %4661 = vst [vmem:[#allocation6_spill] sm:$0xff] %v3206_v40 }
   0xf   :  { %2630 = vmatprep.mubr.msk.f32.mxu0 %vm339_vm1, %v3063_v16 }
  0x11   :  { %2679 = vmatmul.mubr.msk.f32.gmra.mxu1 %vm339_vm1, %v3074_v17 }
  0x12   :  { %2631 = vmatmul.mubr.msk.f32.gmra.mxu0 %vm339_vm1, %v3081_v18  ;;  %2681 = vmatprep.mubr.msk.f32.mxu1 %vm339_vm1, %v3086_v19 }
  0x13   :  { %2633 = vmatprep.mubr.msk.f32.mxu0 %vm339_vm1, %v3091_v20 }
  0x15   :  { %2682 = vmatmul.mubr.msk.f32.gmra.mxu1 %vm339_vm1, %v3102_v21 }
  0x16   :  { %2634 = vmatmul.mubr.msk.f32.gmra.mxu0 %vm339_vm1, %v3109_v22  ;;  %2684 = vmatprep.mubr.msk.f32.mxu1 %vm339_vm1, %v3114_v23 }
  0x17   :  { %2636 = vmatprep.mubr.msk.f32.mxu0 %vm339_vm1, %v3119_v24 }
  0x19   :  { %2685 = vmatmul.mubr.msk.f32.gmra.mxu1 %vm339_vm1, %v3130_v25 }
  0x1a   :  { %2637 = vmatmul.mubr.msk.f32.gmra.mxu0 %vm339_vm1, %v3137_v26  ;;  %2687 = vmatprep.mubr.msk.f32.mxu1 %vm339_vm1, %v3142_v27 }
  0x1b   :  { %2639 = vmatprep.mubr.msk.f32.mxu0 %vm339_vm1, %v3147_v28 }
  0x1d   :  { %2688 = vmatmul.mubr.msk.f32.gmra.mxu1 %vm339_vm1, %v3158_v29 }
  0x1e   :  { %2640 = vmatmul.mubr.msk.f32.gmra.mxu0 %vm339_vm1, %v3165_v30  ;;  %2690 = vmatprep.mubr.msk.f32.mxu1 %vm339_vm1, %v3170_v31 }
  0x1f   :  { %2642 = vmatprep.mubr.msk.f32.mxu0 %vm339_vm1, %v3175_v32 }
  0x21   :  { %2691 = vmatmul.mubr.msk.f32.gmra.mxu1 %vm339_vm1, %v3186_v33 }
  0x22   :  { %2643 = vmatmul.mubr.msk.f32.gmra.mxu0 %vm339_vm1, %v3193_v35  ;;  %2693 = vmatprep.mubr.msk.f32.mxu1 %vm339_vm1, %v3198_v36 }
  0x23   :  { %7 = vsyncpa [#allocation3], 0  ;;  %2645 = vmatprep.mubr.msk.f32.mxu0 %vm339_vm1, %v3206_v40  ;;  %v3236_v53 = vld [vmem:[%s4636_s0 + $0x88] sm:$0xff]  ;;  %v3241_v54 = vld [vmem:[%s4636_s0 + $0x190] sm:$0xff]  ;;  %v4643_v56 = vrot.slane %v3081_v18, 7  ;;  %vm142_vm2 = vcmp.lt.s32.totalorder %v3225_v48, 1 }
  0x24   :  { %4662 = vst [vmem:[#allocation7_spill] sm:$0xff] %v3236_v53  ;;  %v3250_v59 = vld [vmem:[%s4636_s0 + $0x90] sm:$0xff]  ;;  %v3269_v61 = vld [vmem:[%s4636_s0 + $0x198] sm:$0xff]  ;;  %v3285_v63 = vld [vmem:[%s4636_s0 + $0x1a0] sm:$0xff]  ;;  %vm271_vm3 = vcmp.lt.s32.totalorder %v3225_v48, 7  ;;  %v4670_v38 = vrot.slane %v2987_v5, 7 }
  0x25   :  { %4663 = vst [vmem:[#allocation8_spill] sm:$0xff] %v3250_v59  ;;  %2694 = vmatmul.mubr.msk.f32.gmra.mxu1 %vm339_vm1, %v3223_v47  ;;  %v3280_v0 = vld [vmem:[%s4636_s0 + $0x98] sm:$0xff]  ;;  %v3294_v60 = vld [vmem:[%s4636_s0 + $0xa0] sm:$0xff]  ;;  %v3313_v46 = vld [vmem:[%s4636_s0 + $0x1a8] sm:$0xff]  ;;  %v3442_v41 = vsel %vm142_vm2, %v4643_v56, %v76_v39  ;;  %v4671_v37 = vrot.slane %v2987_v5, 1  ;;  %v4687_v32 = vrot.slane %v2998_v7, 1 }
  0x26   :  { %2646 = vmatmul.mubr.msk.f32.gmra.mxu0 %vm339_vm1, %v3236_v53  ;;  %2696 = vmatprep.mubr.msk.f32.mxu1 %vm339_vm1, %v3241_v54  ;;  %4664 = vst [vmem:[#allocation9_spill] sm:$0xff] %v3280_v0  ;;  %4665 = vst [vmem:[#allocation10_spill] sm:$0xff] %v3294_v60  ;;  %v3324_v62 = vld [vmem:[%s4636_s0 + $0xa8] sm:$0xff]  ;;  %v3329_v52 = vld [vmem:[%s4636_s0 + $0x1b0] sm:$0xff]  ;;  %v4677_v53 = vrot.slane %v3022_v10, 1 }
  0x27   :  { %2648 = vmatprep.mubr.msk.f32.mxu0 %vm339_vm1, %v3250_v59  ;;  %4666 = vst [vmem:[#allocation11_spill] sm:$0xff] %v3324_v62  ;;  %v3338_v49 = vld [vmem:[%s4636_s0 + $0xb0] sm:$0xff]  ;;  %v3357_v42 = vld [vmem:[%s4636_s0 + $0x1b8] sm:$0xff]  ;;  %v3362_v6 = vld [vmem:[%s4636_s0 + $0x1c0] sm:$0xff] }
  0x28   :  { %4667 = vst [vmem:[#allocation12_spill] sm:$0xff] %v3338_v49  ;;  %v3371_v58 = vld [vmem:[%s4636_s0 + $0xb8] sm:$0xff]  ;;  %v3377_v43 = vld [vmem:[%s4636_s0 + $0xc0] sm:$0xff]  ;;  %v3382_v55 = vld [vmem:[%s4636_s0 + $0x1c8] sm:$0xff] }
  0x29   :  { %2697 = vmatmul.mubr.msk.f32.gmra.mxu1 %vm339_vm1, %v3269_v61  ;;  %4668 = vst [vmem:[#allocation13_spill] sm:$0xff] %v3371_v58  ;;  %4669 = vst [vmem:[#allocation14_spill] sm:$0xff] %v3377_v43  ;;  %v3390_v34 = vld [vmem:[%s4636_s0 + $0x1d0] sm:$0xff]  ;;  %v3395_v57 = vld [vmem:[%s4636_s0 + $0x1d8] sm:$0xff] }
  0x2a   :  { %2649 = vmatmul.mubr.msk.f32.gmra.mxu0 %vm339_vm1, %v3280_v0  ;;  %2699 = vmatprep.mubr.msk.f32.mxu1 %vm339_vm1, %v3285_v63  ;;  %v3406_v50 = vld [vmem:[%s4636_s0 + $0x1e0] sm:$0xff]  ;;  %v3411_v51 = vld [vmem:[%s4636_s0 + $0x1e8] sm:$0xff]  ;;  %v3425_v45 = vld [vmem:[%s4636_s0 + $0x1f0] sm:$0xff]  ;;  %v4676_v0 = vrot.slane %v2987_v5, 7 }
  0x2b   :  { %2651 = vmatprep.mubr.msk.f32.mxu0 %vm339_vm1, %v3294_v60  ;;  %v3432_v44 = vld [vmem:[%s4636_s0 + $0xc8] sm:$0xff]  ;;  %v3455_v4 = vld [vmem:[%s4636_s0 + $0xd0] sm:$0xff]  ;;  %v4674_v60 = vmov %v4671_v37 }
  0x2d   :  { %2700 = vmatmul.mubr.msk.f32.gmra.mxu1 %vm339_vm1, %v3313_v46 }
  0x2e   :  { %2652 = vmatmul.mubr.msk.f32.gmra.mxu0 %vm339_vm1, %v3324_v62  ;;  %2702 = vmatprep.mubr.msk.f32.mxu1 %vm339_vm1, %v3329_v52  ;;  %v4673_v62 = vrot.slane %v3006_v8, 1 }
  0x2f   :  { %2654 = vmatprep.mubr.msk.f32.mxu0 %vm339_vm1, %v3338_v49  ;;  %v4672_v49 = vrot.slane %v2969_v2, 1 }
  0x31   :  { %2703 = vmatmul.mubr.msk.f32.gmra.mxu1 %vm339_vm1, %v3357_v42  ;;  %v3463_v56 = vsel %vm271_vm3, %v4672_v49, %v4671_v37  ;;  %v4678_v37 = vmov %v4673_v62 }
  0x32   :  { %2655 = vmatmul.mubr.msk.f32.gmra.mxu0 %vm339_vm1, %v3371_v58  ;;  %2705 = vmatprep.mubr.msk.f32.mxu1 %vm339_vm1, %v3362_v6  ;;  %v3487_v49 = vsel %vm271_vm3, %v4678_v37, %v4677_v53  ;;  %v4684_v53 = vrot.slane %v2976_v3, 1  ;;  %v4685_v37 = vrot.slane %v2964_v1, 1 }
  0x33   :  { %2657 = vmatprep.mubr.msk.f32.mxu0 %vm339_vm1, %v3377_v43  ;;  %v3450_v43 = vsel %vm142_vm2, %v76_v39, %v4670_v38  ;;  %v3471_v38 = vsel %vm271_vm3, %v4674_v60, %v4673_v62  ;;  %v4675_v39 = vrot.slane %v3006_v8, 7  ;;  %v4679_v60 = vrot.slane %v2964_v1, 7 }
  0x34   :  { %v4680_v62 = vrot.slane %v3074_v17, 7  ;;  %v3513_v40 = vsel %vm271_vm3, %v4685_v37, %v4684_v53 }
  0x35   :  { %v3479_v59 = vsel %vm142_vm2, %v4676_v0, %v4675_v39  ;;  %2706 = vmatmul.mubr.msk.f32.gmra.mxu1 %vm339_vm1, %v3382_v55  ;;  %v4681_v0 = vrot.slane %v2976_v3, 7  ;;  %v4682_v39 = vmov %v4679_v60  ;;  %4686 = vst [vmem:[#allocation16_spill] sm:$0xff] %v3513_v40  ;;  %v3557_v3 = vld [vmem:[%s4636_s0 + $0xd8] sm:$0xff] }
  0x36   :  { %v3497_v5 = vsel %vm142_vm2, %v4680_v62, %v4679_v60  ;;  %v4688_v60 = vmov %v4684_v53  ;;  %2658 = vmatmul.mubr.msk.f32.gmra.mxu0 %vm339_vm1, %v3432_v44  ;;  %2708 = vmatprep.mubr.msk.f32.mxu1 %vm339_vm1, %v3390_v34 }
  0x37   :  { %v3505_v58 = vsel %vm142_vm2, %v4682_v39, %v4681_v0  ;;  %v3521_v62 = vsel %vm271_vm3, %v4688_v60, %v4687_v32  ;;  %v4690_v39 = vrot.slane %v2998_v7, 7  ;;  %v4691_v53 = vmov %v4681_v0  ;;  %2660 = vmatprep.mubr.msk.f32.mxu0 %vm339_vm1, %v3455_v4 }
  0x38   :  { %4683 = vst [vmem:[#allocation15_spill] sm:$0xff] %v3505_v58  ;;  %4689 = vst [vmem:[#allocation17_spill] sm:$0xff] %v3521_v62  ;;  %v4693_v58 = vrot.slane %v3014_v9, 7  ;;  %v4696_v62 = vrot.slane %v3014_v9, 1  ;;  %v4697_v0 = vrot.slane %v2998_v7, 1  ;;  %v4701_v7 = vrot.slane %v3027_v11, 7 }
  0x39   :  { %v3534_v37 = vsel %vm142_vm2, %v4691_v53, %v4690_v39  ;;  %v4694_v32 = vmov %v4690_v39  ;;  %v4699_v39 = vrot.slane %v3027_v11, 1  ;;  %v4712_v11 = vrot.slane %v3046_v13, 7  ;;  %2709 = vmatmul.mubr.msk.f32.gmra.mxu1 %vm339_vm1, %v3395_v57 }
  0x3a   :  { %4692 = vst [vmem:[#allocation18_spill] sm:$0xff] %v3534_v37  ;;  %v3542_v60 = vsel %vm142_vm2, %v4694_v32, %v4693_v58  ;;  %v3550_v40 = vsel %vm271_vm3, %v4697_v0, %v4696_v62  ;;  %v4700_v58 = vmov %v4696_v62  ;;  %v4702_v62 = vrot.slane %v3014_v9, 7  ;;  %v3594_v9 = vld [vmem:[%s4636_s0 + $0xe0] sm:$0xff]  ;;  %2661 = vmatmul.mubr.msk.f32.gmra.mxu0 %vm339_vm1, %v3557_v3  ;;  %2711 = vmatprep.mubr.msk.f32.mxu1 %vm339_vm1, %v3406_v50 }
  0x3b   :  { %4695 = vst [vmem:[#allocation19_spill] sm:$0xff] %v3542_v60  ;;  %4698 = vst [vmem:[#allocation20_spill] sm:$0xff] %v3550_v40  ;;  %v3565_v53 = vsel %vm271_vm3, %v4700_v58, %v4699_v39  ;;  %v4704_v32 = vrot.slane %v3046_v13, 7  ;;  %v4705_v60 = vmov %v4701_v7  ;;  %v4707_v37 = vrot.slane %v3046_v13, 1  ;;  %v3633_v13 = vld [vmem:[%s4636_s0 + $0x1f8] sm:$0xff]  ;;  %2663 = vmatprep.mubr.msk.f32.mxu0 %vm339_vm1, %v3594_v9 }
  0x3c   :  { %v3573_v0 = vsel %vm142_vm2, %v4702_v62, %v4701_v7  ;;  %v4709_v7 = vrot.slane %v3058_v15, 1 }
  0x3d   :  { %4703 = vst [vmem:[#allocation21_spill] sm:$0xff] %v3573_v0  ;;  %v3581_v40 = vsel %vm142_vm2, %v4705_v60, %v4704_v32  ;;  %v3589_v58 = vsel %vm271_vm3, %v4699_v39, %v4707_v37  ;;  %v4710_v62 = vmov %v4707_v37  ;;  %v4711_v32 = vrot.slane %v3058_v15, 7  ;;  %2712 = vmatmul.mubr.msk.f32.gmra.mxu1 %vm339_vm1, %v3411_v51 }
  0x3e   :  { %4706 = vst [vmem:[#allocation22_spill] sm:$0xff] %v3581_v40  ;;  %4708 = vst [vmem:[#allocation23_spill] sm:$0xff] %v3589_v58  ;;  %v3602_v60 = vsel %vm271_vm3, %v4710_v62, %v4709_v7  ;;  %v4713_v39 = vrot.slane %v3074_v17, 7  ;;  %v4716_v0 = vrot.slane %v3074_v17, 1  ;;  %v4720_v15 = vrot.slane %v3086_v19, 7  ;;  %2714 = vmatprep.mubr.msk.f32.mxu1 %vm339_vm1, %v3425_v45 }
  0x3f   :  { %v3610_v37 = vsel %vm142_vm2, %v4712_v11, %v4711_v32  ;;  %v4714_v40 = vmov %v4711_v32  ;;  %v4717_v32 = vrot.slane %v2964_v1, 1  ;;  %v4726_v17 = vrot.slane %v3102_v21, 1 }
  0x40   :  { %v3618_v58 = vsel %vm142_vm2, %v4714_v40, %v4713_v39  ;;  %v3626_v62 = vsel %vm271_vm3, %v4709_v7, %v4716_v0  ;;  %v4718_v40 = vmov %v4716_v0  ;;  %v4721_v0 = vrot.slane %v3186_v33, 7 }
  0x41   :  { %4715 = vst [vmem:[#allocation24_spill] sm:$0xff] %v3618_v58  ;;  %v3641_v11 = vsel %vm271_vm3, %v4718_v40, %v4717_v32  ;;  %v4723_v7 = vrot.slane %v3102_v21, 7  ;;  %v4724_v58 = vmov %v4720_v15  ;;  %v4727_v32 = vrot.slane %v3086_v19, 1  ;;  %2715 = vmatmul.mubr.msk.f32.gmra.mxu1 %vm339_vm1, %v3633_v13 }
  0x42   :  { %4719 = vst [vmem:[#allocation25_spill] sm:$0xff] %v3641_v11  ;;  %v3649_v39 = vsel %vm142_vm2, %v4721_v0, %v4720_v15  ;;  %v139_v15 = vrot.slane %v3633_v13, 7  ;;  %v4729_v0 = vrot.slane %v3114_v23, 1  ;;  %2719 = vmatprep.mubr.msk.f32.mxu1 %vm339_vm1, %v3442_v41  ;;  %v4853_v48 = vld [vmem:[#allocation20_spill] sm:$0xff] }
  0x43   :  { %4722 = vst [vmem:[#allocation26_spill] sm:$0xff] %v3649_v39  ;;  %v3657_v1 = vsel %vm142_vm2, %v4724_v58, %v4723_v7  ;;  %v3665_v40 = vsel %vm271_vm3, %v4727_v32, %v4726_v17  ;;  %v4730_v58 = vmov %v4726_v17  ;;  %v4733_v17 = vrot.slane %v3102_v21, 7 }
  0x44   :  { %4725 = vst [vmem:[#allocation27_spill] sm:$0xff] %v3657_v1  ;;  %4728 = vst [vmem:[#allocation28_spill] sm:$0xff] %v3665_v40  ;;  %v3678_v7 = vsel %vm271_vm3, %v4730_v58, %v4729_v0  ;;  %v4732_v1 = vrot.slane %v3114_v23, 7  ;;  %v4735_v40 = vrot.slane %v3130_v25, 7  ;;  %v3701_v0 = vld [vmem:[%s4636_s0 + $0xe8] sm:$0xff]  ;;  %v4738_v21 = vrot.slane %v3130_v25, 1 }
  0x45   :  { %4731 = vst [vmem:[#allocation29_spill] sm:$0xff] %v3678_v7  ;;  %2664 = vmatmul.mubr.msk.f32.gmra.mxu0 %vm339_vm1, %v3701_v0  ;;  %2720 = vmatmul.mubr.msk.f32.vlgmr.msra.gmra.mxu1 %vm339_vm1, %v3450_v43  ;;  %v4828_v43 = vrot.slane %v3362_v6, 1 }
  0x46   :  { %v3686_v32 = vsel %vm142_vm2, %v4733_v17, %v4732_v1  ;;  %v4736_v39 = vmov %v4732_v1  ;;  %v4739_v1 = vrot.slane %v3114_v23, 1  ;;  %v4740_v17 = vrot.slane %v3142_v27, 1  ;;  %2722 = vmatprep.mubr.msk.f32.mxu1 %vm339_vm1, %v3479_v59 }
  0x47   :  { %4734 = vst [vmem:[#allocation30_spill] sm:$0xff] %v3686_v32  ;;  %v3694_v11 = vsel %vm142_vm2, %v4736_v39, %v4735_v40  ;;  %v4741_v39 = vmov %v4738_v21  ;;  %v4744_v32 = vrot.slane %v3130_v25, 7  ;;  %v4746_v23 = vrot.slane %v3158_v29, 7 }
  0x48   :  { %4737 = vst [vmem:[#allocation31_spill] sm:$0xff] %v3694_v11  ;;  %v3709_v58 = vsel %vm271_vm3, %v4739_v1, %v4738_v21  ;;  %v3717_v40 = vsel %vm271_vm3, %v4741_v39, %v4740_v17  ;;  %v4743_v11 = vrot.slane %v3142_v27, 7  ;;  %v3738_v17 = vld [vmem:[%s4636_s0 + $0xf0] sm:$0xff]  ;;  %v4749_v39 = vrot.slane %v3158_v29, 1 }
  0x49   :  { %4742 = vst [vmem:[#allocation32_spill] sm:$0xff] %v3717_v40  ;;  %v4750_v25 = vrot.slane %v3142_v27, 1  ;;  %v4756_v27 = vrot.slane %v3186_v33, 7  ;;  %2666 = vmatprep.mubr.msk.f32.mxu0 %vm339_vm1, %v3738_v17 }
  0x4a   :  { %v3725_v7 = vsel %vm142_vm2, %v4744_v32, %v4743_v11  ;;  %v4747_v21 = vmov %v4743_v11  ;;  %v4751_v32 = vrot.slane %v3170_v31, 1 }
  0x4b   :  { %4745 = vst [vmem:[#allocation33_spill] sm:$0xff] %v3725_v7  ;;  %v3733_v1 = vsel %vm142_vm2, %v4747_v21, %v4746_v23  ;;  %v3746_v11 = vsel %vm271_vm3, %v4750_v25, %v4749_v39  ;;  %v4752_v7 = vmov %v4749_v39  ;;  %v4753_v21 = vrot.slane %v3170_v31, 7 }
  0x4c   :  { %4748 = vst [vmem:[#allocation34_spill] sm:$0xff] %v3733_v1  ;;  %v3754_v23 = vsel %vm271_vm3, %v4752_v7, %v4751_v32  ;;  %v4754_v1 = vrot.slane %v3158_v29, 7  ;;  %v4759_v7 = vrot.slane %v3186_v33, 1  ;;  %v4766_v31 = vrot.slane %v3223_v47, 7 }
  0x4d   :  { %v4757_v39 = vmov %v4753_v21  ;;  %v270_v33 = vrot.slane %v3633_v13, 1 }
  0x4e   :  { %v3762_v40 = vsel %vm142_vm2, %v4754_v1, %v4753_v21  ;;  %v3770_v25 = vsel %vm142_vm2, %v4757_v39, %v4756_v27  ;;  %v3780_v29 = vsel %vm271_vm3, %v4751_v32, %v4759_v7  ;;  %v4760_v1 = vrot.slane %v3086_v19, 1 }
  0x4f   :  { %4755 = vst [vmem:[#allocation35_spill] sm:$0xff] %v3762_v40  ;;  %4758 = vst [vmem:[#allocation36_spill] sm:$0xff] %v3770_v25  ;;  %v4761_v21 = vmov %v4759_v7  ;;  %v4763_v27 = vrot.slane %v3198_v36, 7  ;;  %v4764_v39 = vrot.slane %v3357_v42, 7  ;;  %v4769_v32 = vrot.slane %v3223_v47, 1 }
  0x50   :  { %v3788_v40 = vsel %vm271_vm3, %v4761_v21, %v4760_v1  ;;  %v4770_v1 = vrot.slane %v3198_v36, 1 }
  0x51   :  { %4762 = vst [vmem:[#allocation37_spill] sm:$0xff] %v3788_v40  ;;  %v3796_v25 = vsel %vm142_vm2, %v4764_v39, %v4763_v27  ;;  %v4767_v7 = vmov %v4763_v27  ;;  %v4772_v27 = vrot.slane %v3241_v54, 1  ;;  %v4773_v39 = vmov %v4769_v32 }
  0x52   :  { %4765 = vst [vmem:[#allocation38_spill] sm:$0xff] %v3796_v25  ;;  %v3804_v19 = vsel %vm142_vm2, %v4767_v7, %v4766_v31  ;;  %v3817_v21 = vsel %vm271_vm3, %v4770_v1, %v4769_v32  ;;  %v4775_v7 = vrot.slane %v3241_v54, 7  ;;  %v3840_v32 = vld [vmem:[%s4636_s0 + $0xf8] sm:$0xff]  ;;  %v4778_v1 = vrot.slane %v3269_v61, 7  ;;  %s2940_s0 = smov [#allocation2]  }
  0x53   :  { %4768 = vst [vmem:[#allocation39_spill] sm:$0xff] %v3804_v19  ;;  %4771 = vst [vmem:[#allocation40_spill] sm:$0xff] %v3817_v21  ;;  %v3825_v31 = vsel %vm271_vm3, %v4773_v39, %v4772_v27  ;;  %v4776_v19 = vrot.slane %v3223_v47, 7  ;;  %v4781_v47 = vrot.slane %v3269_v61, 1  ;;  %v4785_v40 = vrot.slane %v3285_v63, 7  ;;  %2667 = vmatmul.mubr.msk.f32.gmra.mxu0 %vm339_vm1, %v3840_v32  ;;  %s2216_s1 = sshll.u32 %s2940_s0, 4  ;;  %s2217_s1 = int_to_ptr.vmem [resolvable:$true] %s2216_s1 }
  0x54   :  { %4774 = vst [vmem:[#allocation41_spill] sm:$0xff] %v3825_v31  ;;  %v4779_v27 = vmov %v4775_v7  ;;  %v4790_v61 = vrot.slane %v3329_v52, 1  ;;  %2817 = vmatprep.mubr.msk.f32.mxu0 %vm339_vm1, %v3463_v56  ;;  %v4816_v56 = vrot.slane %v3390_v34, 1  ;;  %s2918_s27 = scalar_lea.vmem %s2217_s1, 8192  ;;  %p2923_p1 = scmp.lt.s32.totalorder %s2217_s1, %s2217_s1 }
  0x55   :  { %v3833_v25 = vsel %vm142_vm2, %v4776_v19, %v4775_v7  ;;  %v3848_v39 = vsel %vm142_vm2, %v4779_v27, %v4778_v1  ;;  %v4782_v19 = vrot.slane %v3241_v54, 1  ;;  %v4784_v31 = vmov %v4781_v47  ;;  %p2919_p0 = scmp.ne.s32.totalorder %s2217_s1, %s2918_s27  ;;  %p2924_p2 = scmp.lt.s32.totalorder %s2918_s27, %s2918_s27 }
  0x56   :  { %4777 = vst [vmem:[#allocation42_spill] sm:$0xff] %v3833_v25  ;;  %4780 = vst [vmem:[#allocation43_spill] sm:$0xff] %v3848_v39  ;;  %v4783_v25 = vrot.slane %v3285_v63, 1  ;;  %v3872_v27 = vsel %vm142_vm2, %v4778_v1, %v4785_v40  ;;  %v4787_v54 = vrot.slane %v3313_v46, 7  ;;  %v4789_v39 = vrot.slane %v3313_v46, 1 }
  0x57   :  { %v3856_v7 = vsel %vm271_vm3, %v4782_v19, %v4781_v47  ;;  %4786 = vst [vmem:[#allocation44_spill] sm:$0xff] %v3872_v27  ;;  %v4788_v47 = vmov %v4785_v40  ;;  %v4792_v27 = vrot.slane %v3329_v52, 7  ;;  %v4794_v63 = vrot.slane %v3357_v42, 7  ;;  %2818 = vmatmul.mubr.msk.f32.vlgmr.msra.gmra.mxu0 %vm339_vm1, %v3471_v38  ;;  %p2925_p3 = por %p2924_p2, %p2923_p1 }
  0x58   :  { %v3864_v21 = vsel %vm271_vm3, %v4784_v31, %v4783_v25  ;;  %v3880_v19 = vsel %vm142_vm2, %v4788_v47, %v4787_v54  ;;  %v3888_v31 = vsel %vm271_vm3, %v4783_v25, %v4789_v39  ;;  %v4791_v40 = vmov %v4789_v39  ;;  %2820 = vmatprep.mubr.msk.f32.mxu0 %vm339_vm1, %v3487_v49 }
  0x59   :  { %v3896_v1 = vsel %vm271_vm3, %v4791_v40, %v4790_v61  ;;  %v3904_v47 = vsel %vm142_vm2, %v4787_v54, %v4792_v27  ;;  %v4795_v39 = vmov %v4792_v27  ;;  %v4796_v61 = vrot.slane %v3357_v42, 1  ;;  %p2926_p4 = pnand %p2925_p3, %p2919_p0 }
  0x5a   :  { %4793 = vst [vmem:[#allocation45_spill] sm:$0xff] %v3904_v47  ;;  %v3914_v25 = vsel %vm142_vm2, %v4795_v39, %v4794_v63  ;;  %v4797_v40 = vrot.slane %v3329_v52, 1  ;;  %v4798_v27 = vrot.slane %v3198_v36, 1  ;;  %v4800_v47 = vrot.slane %v3362_v6, 7 }
  0x5b   :  { %v4799_v13 = vmov %v4796_v61  ;;  %v247_v52 = vrot.slane %v3053_v14, 1  ;;  %v4801_v36 = vrot.slane %v3382_v55, 7  ;;  %v4832_v38 = vrot.slane %v3022_v10, 1 }
  0x5c   :  { %v3922_v46 = vsel %vm271_vm3, %v4797_v40, %v4796_v61  ;;  %v3930_v54 = vsel %vm271_vm3, %v4799_v13, %v4798_v27  ;;  %v3936_v63 = vsel %vm142_vm2, %v139_v15, %v4800_v47  ;;  %v4802_v42 = vmov %v4800_v47 }
  0x5d   :  { %v3949_v39 = vsel %vm142_vm2, %v4802_v42, %v4801_v36  ;;  %v4804_v61 = vrot.slane %v3382_v55, 1  ;;  %v4805_v47 = vrot.slane %v3362_v6, 1  ;;  %v4807_v27 = vrot.slane %v3390_v34, 1 }
  0x5e   :  { %4803 = vst [vmem:[#allocation46_spill] sm:$0xff] %v3949_v39  ;;  %v4809_v36 = vrot.slane %v3390_v34, 7  ;;  %v4810_v42 = vrot.slane %v3382_v55, 7  ;;  %v4817_v55 = vrot.slane %v3406_v50, 1  ;;  %v4820_v34 = vrot.slane %v3411_v51, 7 }
  0x5f   :  { %v3957_v40 = vsel %vm271_vm3, %v4805_v47, %v4804_v61  ;;  %v4808_v41 = vmov %v4804_v61  ;;  %v4812_v61 = vrot.slane %v3395_v57, 7  ;;  %v124_v6 = vrot.slane %v3063_v16, 7 }
  0x60   :  { %4806 = vst [vmem:[#allocation47_spill] sm:$0xff] %v3957_v40  ;;  %v3965_v13 = vsel %vm271_vm3, %v4808_v41, %v4807_v27  ;;  %v3975_v39 = vsel %vm142_vm2, %v4810_v42, %v4809_v36  ;;  %v4813_v47 = vmov %v4809_v36  ;;  %v4815_v27 = vrot.slane %v3395_v57, 1 }
  0x61   :  { %4811 = vst [vmem:[#allocation48_spill] sm:$0xff] %v3975_v39  ;;  %v3983_v40 = vsel %vm142_vm2, %v4813_v47, %v4812_v61  ;;  %v4819_v39 = vrot.slane %v3406_v50, 7  ;;  %v4823_v57 = vrot.slane %v3425_v45, 1 }
  0x62   :  { %4814 = vst [vmem:[#allocation49_spill] sm:$0xff] %v3983_v40  ;;  %v3991_v41 = vsel %vm271_vm3, %v4816_v56, %v4815_v27  ;;  %v4818_v36 = vmov %v4815_v27  ;;  %v4822_v40 = vrot.slane %v3411_v51, 1 }
  0x63   :  { %v3999_v42 = vsel %vm271_vm3, %v4818_v36, %v4817_v55  ;;  %v4007_v47 = vsel %vm142_vm2, %v4812_v61, %v4819_v39  ;;  %v4821_v27 = vmov %v4819_v39 }
  0x64   :  { %v4015_v56 = vsel %vm142_vm2, %v4821_v27, %v4820_v34  ;;  %v4023_v36 = vsel %vm271_vm3, %v4817_v55, %v4822_v40  ;;  %v4824_v39 = vmov %v4822_v40  ;;  %v4825_v34 = vrot.slane %v3425_v45, 7 }
  0x65   :  { %v4031_v61 = vsel %vm271_vm3, %v4824_v39, %v4823_v57  ;;  %v4826_v27 = vrot.slane %v3411_v51, 7  ;;  %v4053_v39 = vsel %vm271_vm3, %v4823_v57, %v270_v33  ;;  %v4059_v51 = vsel %vm271_vm3, %v270_v33, %v4828_v43 }
  0x66   :  { %v4827_v40 = vmov %v4825_v34  ;;  %v4829_v45 = vrot.slane %v3022_v10, 7  ;;  %v255_v33 = vrot.slane %v3063_v16, 1  ;;  %v263_v43 = vrot.slane %v3081_v18, 1 }
  0x67   :  { %v4041_v50 = vsel %vm142_vm2, %v4826_v27, %v4825_v34  ;;  %v4047_v55 = vsel %vm142_vm2, %v4827_v40, %v139_v15  ;;  %v116_v34 = vrot.slane %v3053_v14, 7  ;;  %v4830_v15 = vrot.slane %v3006_v8, 7 }
  0x68   :  { %v4831_v14 = vrot.slane %v3035_v12, 1  ;;  %v4833_v40 = vrot.slane %v3035_v12, 7  ;;  %v4834_v8 = vmov %v4829_v45  ;;  %v272_v12 = vsel %vm271_vm3, %v255_v33, %v263_v43 }
  0x69   :  { %v175_v27 = vsel %vm142_vm2, %v4830_v15, %v4829_v45  ;;  %v77_v15 = vrot.slane %v3091_v20, 7 }
  0x6a   :  { %v296_v59 = vsel %vm271_vm3, %v4832_v38, %v4831_v14  ;;  %v167_v57 = vsel %vm142_vm2, %v4834_v8, %v4833_v40  ;;  %v4835_v16 = vmov %v4831_v14  ;;  %2723 = vmatmul.mubr.msk.f32.gmra.mxu1 %vm339_vm1, %v175_v27  ;;  %v4836_v45 = vmov %v4833_v40 }
  0x6b   :  { %v288_v49 = vsel %vm271_vm3, %v4835_v16, %v247_v52  ;;  %2821 = vmatmul.mubr.msk.f32.gmra.mxu0 %vm339_vm1, %v296_v59  ;;  %2725 = vmatprep.mubr.msk.f32.mxu1 %vm339_vm1, %v167_v57  ;;  %v159_v10 = vsel %vm142_vm2, %v4836_v45, %v116_v34  ;;  %v133_v14 = vrot.slane %v3193_v35, 7  ;;  %v280_v38 = vsel %vm271_vm3, %v247_v52, %v255_v33 }
  0x6c   :  { %2823 = vmatprep.mubr.msk.f32.mxu0 %vm339_vm1, %v288_v49  ;;  %v151_v27 = vsel %vm142_vm2, %v116_v34, %v124_v6  ;;  %v208_v59 = vrot.slane %v3091_v20, 1  ;;  %v216_v40 = vrot.slane %v3109_v22, 1  ;;  %v85_v8 = vrot.slane %v3109_v22, 7 }
  0x6d   :  { %v4837_v52 = vrot.slane %v3081_v18, 7  ;;  %v93_v20 = vrot.slane %v3119_v24, 7  ;;  %v224_v57 = vrot.slane %v3119_v24, 1  ;;  %v4838_v33 = vrot.slane %v2969_v2, 1 }
  0x6e   :  { %2726 = vmatmul.mubr.msk.f32.gmra.mxu1 %vm339_vm1, %v159_v10  ;;  %v200_v16 = vsel %vm142_vm2, %v133_v14, %v77_v15  ;;  %v232_v49 = vrot.slane %v3137_v26, 1  ;;  %v321_v18 = vsel %vm271_vm3, %v208_v59, %v216_v40  ;;  %v192_v2 = vsel %vm142_vm2, %v77_v15, %v85_v8 }
  0x6f   :  { %2824 = vmatmul.mubr.msk.f32.gmra.mxu0 %vm339_vm1, %v280_v38  ;;  %2728 = vmatprep.mubr.msk.f32.mxu1 %vm339_vm1, %v151_v27  ;;  %v143_v34 = vsel %vm142_vm2, %v124_v6, %v4837_v52  ;;  %v328_v22 = vsel %vm271_vm3, %v263_v43, %v4838_v33  ;;  %v101_v6 = vrot.slane %v3137_v26, 7  ;;  %v109_v24 = vrot.slane %v3147_v28, 7  ;;  %v4839_v27 = vld [vmem:[#allocation5_spill] sm:$0xff] }
  0x70   :  { %2826 = vmatprep.mubr.msk.f32.mxu0 %vm339_vm1, %v272_v12  ;;  %v240_v43 = vrot.slane %v3147_v28, 1  ;;  %v313_v45 = vsel %vm271_vm3, %v216_v40, %v224_v57  ;;  %v184_v10 = vsel %vm142_vm2, %v85_v8, %v93_v20  ;;  %v248_v26 = vrot.slane %v3165_v30, 1 }
  0x71   :  { %v305_v38 = vsel %vm271_vm3, %v224_v57, %v232_v49  ;;  %v117_v15 = vrot.slane %v3165_v30, 7  ;;  %v176_v28 = vsel %vm142_vm2, %v93_v20, %v101_v6  ;;  %v125_v40 = vrot.slane %v4839_v27, 7  ;;  %v4840_v57 = vld [vmem:[#allocation6_spill] sm:$0xff] }
  0x72   :  { %2729 = vmatmul.mubr.msk.f32.gmra.mxu1 %vm339_vm1, %v143_v34  ;;  %v256_v12 = vrot.slane %v4839_v27, 1  ;;  %v297_v8 = vsel %vm271_vm3, %v232_v49, %v240_v43  ;;  %v168_v52 = vsel %vm142_vm2, %v101_v6, %v109_v24  ;;  %v264_v30 = vrot.slane %v3193_v35, 1  ;;  %v4842_v6 = vld [vmem:[#allocation7_spill] sm:$0xff]  ;;  %v4844_v27 = vld [vmem:[#allocation9_spill] sm:$0xff] }
  0x73   :  { %2827 = vmatmul.mubr.msk.f32.gmra.mxu0 %vm339_vm1, %v328_v22  ;;  %2731 = vmatprep.mubr.msk.f32.mxu1 %vm339_vm1, %v200_v16  ;;  %v289_v34 = vsel %vm271_vm3, %v240_v43, %v248_v26  ;;  %v160_v20 = vsel %vm142_vm2, %v109_v24, %v117_v15  ;;  %v78_v33 = vrot.slane %v4840_v57, 7  ;;  %v4841_v22 = vld [vmem:[#allocation13_spill] sm:$0xff]  ;;  %v152_v49 = vsel %vm142_vm2, %v117_v15, %v125_v40 }
  0x74   :  { %2829 = vmatprep.mubr.msk.f32.mxu0 %vm339_vm1, %v321_v18  ;;  %v134_v16 = vrot.slane %v4841_v22, 7  ;;  %v281_v35 = vsel %vm271_vm3, %v248_v26, %v256_v12  ;;  %v209_v18 = vrot.slane %v4840_v57, 1  ;;  %v273_v43 = vsel %vm271_vm3, %v256_v12, %v264_v30  ;;  %v4846_v57 = vld [vmem:[#allocation11_spill] sm:$0xff] }
  0x75   :  { %v86_v24 = vrot.slane %v4842_v6, 7  ;;  %v329_v15 = vsel %vm271_vm3, %v264_v30, %v208_v59  ;;  %v233_v12 = vrot.slane %v4844_v27, 1  ;;  %v4845_v59 = vld [vmem:[#allocation10_spill] sm:$0xff] }
  0x76   :  { %2732 = vmatmul.mubr.msk.f32.gmra.mxu1 %vm339_vm1, %v192_v2  ;;  %v217_v2 = vrot.slane %v4842_v6, 1  ;;  %v241_v30 = vrot.slane %v4845_v59, 1 }
  0x77   :  { %2830 = vmatmul.mubr.msk.f32.gmra.mxu0 %vm339_vm1, %v313_v45  ;;  %2734 = vmatprep.mubr.msk.f32.mxu1 %vm339_vm1, %v184_v10  ;;  %v144_v45 = vsel %vm142_vm2, %v125_v40, %v133_v14  ;;  %v4843_v10 = vld [vmem:[#allocation8_spill] sm:$0xff]  ;;  %v102_v14 = vrot.slane %v4844_v27, 7  ;;  %v193_v40 = vsel %vm142_vm2, %v78_v33, %v86_v24 }
  0x78   :  { %2832 = vmatprep.mubr.msk.f32.mxu0 %vm339_vm1, %v305_v38  ;;  %v94_v26 = vrot.slane %v4843_v10, 7  ;;  %v225_v38 = vrot.slane %v4843_v10, 1 }
  0x7a   :  { %2735 = vmatmul.mubr.msk.f32.gmra.mxu1 %vm339_vm1, %v176_v28  ;;  %v201_v28 = vsel %vm142_vm2, %v134_v16, %v78_v33  ;;  %v118_v33 = vrot.slane %v4846_v57, 7  ;;  %v177_v6 = vsel %vm142_vm2, %v94_v26, %v102_v14 }
  0x7b   :  { %2833 = vmatmul.mubr.msk.f32.gmra.mxu0 %vm339_vm1, %v297_v8  ;;  %2737 = vmatprep.mubr.msk.f32.mxu1 %vm339_vm1, %v168_v52  ;;  %v322_v8 = vsel %vm271_vm3, %v209_v18, %v217_v2  ;;  %v110_v52 = vrot.slane %v4845_v59, 7 }
  0x7c   :  { %2835 = vmatprep.mubr.msk.f32.mxu0 %vm339_vm1, %v289_v34  ;;  %v314_v34 = vsel %vm271_vm3, %v217_v2, %v225_v38  ;;  %v4847_v2 = vld [vmem:[#allocation12_spill] sm:$0xff] }
  0x7d   :  { %v169_v10 = vsel %vm142_vm2, %v102_v14, %v110_v52 }
  0x7e   :  { %2738 = vmatmul.mubr.msk.f32.gmra.mxu1 %vm339_vm1, %v160_v20  ;;  %v185_v20 = vsel %vm142_vm2, %v86_v24, %v94_v26  ;;  %v257_v24 = vrot.slane %v4847_v2, 1  ;;  %v161_v26 = vsel %vm142_vm2, %v110_v52, %v118_v33  ;;  %v87_v52 = vrot.slane %v3432_v44, 7 }
  0x7f   :  { %2836 = vmatmul.mubr.msk.f32.gmra.mxu0 %vm339_vm1, %v281_v35  ;;  %2740 = vmatprep.mubr.msk.f32.mxu1 %vm339_vm1, %v152_v49  ;;  %v249_v35 = vrot.slane %v4846_v57, 1  ;;  %v306_v49 = vsel %vm271_vm3, %v225_v38, %v233_v12  ;;  %v265_v38 = vrot.slane %v4841_v22, 1 }
  0x80   :  { %2838 = vmatprep.mubr.msk.f32.mxu0 %vm339_vm1, %v273_v43  ;;  %v126_v43 = vrot.slane %v4847_v2, 7 }
  0x81   :  { %v282_v22 = vsel %vm271_vm3, %v249_v35, %v257_v24  ;;  %v274_v59 = vsel %vm271_vm3, %v257_v24, %v265_v38  ;;  %v330_v57 = vsel %vm271_vm3, %v265_v38, %v209_v18  ;;  %v111_v18 = vrot.slane %v3594_v9, 7 }
  0x82   :  { %2741 = vmatmul.mubr.msk.f32.gmra.mxu1 %vm339_vm1, %v144_v45  ;;  %v298_v45 = vsel %vm271_vm3, %v233_v12, %v241_v30  ;;  %v135_v12 = vrot.slane %v3840_v32, 7  ;;  %v119_v24 = vrot.slane %v3701_v0, 7 }
  0x83   :  { %2839 = vmatmul.mubr.msk.f32.gmra.mxu0 %vm339_vm1, %v329_v15  ;;  %2743 = vmatprep.mubr.msk.f32.mxu1 %vm339_vm1, %v201_v28  ;;  %v290_v15 = vsel %vm271_vm3, %v241_v30, %v249_v35  ;;  %v4848_v28 = vld [vmem:[#allocation14_spill] sm:$0xff]  ;;  %v145_v30 = vsel %vm142_vm2, %v126_v43, %v134_v16  ;;  %v103_v16 = vrot.slane %v3557_v3, 7 }
  0x84   :  { %2841 = vmatprep.mubr.msk.f32.mxu0 %vm339_vm1, %v322_v8  ;;  %v79_v27 = vrot.slane %v4848_v28, 7  ;;  %v153_v8 = vsel %vm142_vm2, %v118_v33, %v126_v43  ;;  %v210_v14 = vrot.slane %v4848_v28, 1  ;;  %v242_v33 = vrot.slane %v3594_v9, 1 }
  0x86   :  { %2744 = vmatmul.mubr.msk.f32.gmra.mxu1 %vm339_vm1, %v193_v40  ;;  %v218_v40 = vrot.slane %v3432_v44, 1  ;;  %v202_v35 = vsel %vm142_vm2, %v135_v12, %v79_v27  ;;  %v234_v44 = vrot.slane %v3557_v3, 1  ;;  %v250_v3 = vrot.slane %v3701_v0, 1 }
  0x87   :  { %2842 = vmatmul.mubr.msk.f32.gmra.mxu0 %vm339_vm1, %v314_v34  ;;  %2746 = vmatprep.mubr.msk.f32.mxu1 %vm339_vm1, %v185_v20  ;;  %v95_v34 = vrot.slane %v3455_v4, 7  ;;  %v226_v20 = vrot.slane %v3455_v4, 1  ;;  %v194_v4 = vsel %vm142_vm2, %v79_v27, %v87_v52  ;;  %v266_v0 = vrot.slane %v3840_v32, 1 }
  0x88   :  { %2844 = vmatprep.mubr.msk.f32.mxu0 %vm339_vm1, %v306_v49  ;;  %v323_v49 = vsel %vm271_vm3, %v210_v14, %v218_v40  ;;  %v299_v38 = vsel %vm271_vm3, %v234_v44, %v242_v33 }
  0x89   :  { %v186_v2 = vsel %vm142_vm2, %v87_v52, %v95_v34  ;;  %v307_v43 = vsel %vm271_vm3, %v226_v20, %v234_v44  ;;  %v178_v9 = vsel %vm142_vm2, %v95_v34, %v103_v16  ;;  %v4851_v52 = vld [vmem:[#allocation17_spill] sm:$0xff]  ;;  %v4857_v34 = vld [vmem:[#allocation22_spill] sm:$0xff]  ;;  %v4862_v44 = vld [vmem:[#allocation27_spill] sm:$0xff] }
  0x8a   :  { %2747 = vmatmul.mubr.msk.f32.gmra.mxu1 %vm339_vm1, %v177_v6  ;;  %v315_v6 = vsel %vm271_vm3, %v218_v40, %v226_v20  ;;  %v4849_v40 = vld [vmem:[#allocation16_spill] sm:$0xff] }
  0x8b   :  { %2845 = vmatmul.mubr.msk.f32.gmra.mxu0 %vm339_vm1, %v298_v45  ;;  %2749 = vmatprep.mubr.msk.f32.mxu1 %vm339_vm1, %v169_v10  ;;  %v127_v45 = vrot.slane %v3738_v17, 7  ;;  %v258_v10 = vrot.slane %v3738_v17, 1  ;;  %v162_v17 = vsel %vm142_vm2, %v111_v18, %v119_v24  ;;  %v4858_v20 = vld [vmem:[#allocation24_spill] sm:$0xff] }
  0x8c   :  { %2847 = vmatprep.mubr.msk.f32.mxu0 %vm339_vm1, %v290_v15  ;;  %v170_v15 = vsel %vm142_vm2, %v103_v16, %v111_v18  ;;  %v4867_v16 = vld [vmem:[#allocation33_spill] sm:$0xff]  ;;  %v4869_v18 = vld [vmem:[#allocation35_spill] sm:$0xff] }
  0x8d   :  { %v283_v28 = vsel %vm271_vm3, %v250_v3, %v258_v10  ;;  %v154_v32 = vsel %vm142_vm2, %v119_v24, %v127_v45  ;;  %v275_v27 = vsel %vm271_vm3, %v258_v10, %v266_v0  ;;  %v4879_v24 = vld [vmem:[#allocation45_spill] sm:$0xff] }
  0x8e   :  { %2750 = vmatmul.mubr.msk.f32.gmra.mxu1 %vm339_vm1, %v161_v26  ;;  %v291_v26 = vsel %vm271_vm3, %v242_v33, %v250_v3  ;;  %v4871_v33 = vld [vmem:[#allocation37_spill] sm:$0xff]  ;;  %v4876_v3 = vld [vmem:[#allocation42_spill] sm:$0xff] }
  0x8f   :  { %2848 = vmatmul.mubr.msk.f32.gmra.mxu0 %vm339_vm1, %v282_v22  ;;  %2752 = vmatprep.mubr.msk.f32.mxu1 %vm339_vm1, %v153_v8  ;;  %v146_v22 = vsel %vm142_vm2, %v127_v45, %v135_v12  ;;  %v331_v8 = vsel %vm271_vm3, %v266_v0, %v210_v14  ;;  %v4852_v12 = vld [vmem:[#allocation18_spill] sm:$0xff]  ;;  %v4854_v14 = vld [vmem:[#allocation19_spill] sm:$0xff] }
  0x90   :  { %2850 = vmatprep.mubr.msk.f32.mxu0 %vm339_vm1, %v274_v59  ;;  %v4850_v59 = vld [vmem:[#allocation15_spill] sm:$0xff] }
  0x92   :  { %2753 = vmatmul.mubr.msk.f32.gmra.mxu1 %vm339_vm1, %v145_v30  ;;  %v4856_v30 = vld [vmem:[#allocation23_spill] sm:$0xff] }
  0x93   :  { %2851 = vmatmul.mubr.msk.f32.gmra.mxu0 %vm339_vm1, %v330_v57  ;;  %2755 = vmatprep.mubr.msk.f32.mxu1 %vm339_vm1, %v202_v35  ;;  %v4860_v57 = vld [vmem:[#allocation26_spill] sm:$0xff]  ;;  %v4861_v35 = vld [vmem:[#allocation28_spill] sm:$0xff] }
  0x94   :  { %2853 = vmatprep.mubr.msk.f32.mxu0 %vm339_vm1, %v323_v49  ;;  %v4866_v49 = vld [vmem:[#allocation32_spill] sm:$0xff] }
  0x96   :  { %2756 = vmatmul.mubr.msk.f32.gmra.mxu1 %vm339_vm1, %v194_v4  ;;  %v4868_v4 = vld [vmem:[#allocation34_spill] sm:$0xff] }
  0x97   :  { %2854 = vmatmul.mubr.msk.f32.gmra.mxu0 %vm339_vm1, %v315_v6  ;;  %2758 = vmatprep.mubr.msk.f32.mxu1 %vm339_vm1, %v186_v2  ;;  %v4872_v6 = vld [vmem:[#allocation38_spill] sm:$0xff]  ;;  %v4874_v2 = vld [vmem:[#allocation39_spill] sm:$0xff] }
  0x98   :  { %2856 = vmatprep.mubr.msk.f32.mxu0 %vm339_vm1, %v307_v43  ;;  %v4878_v43 = vld [vmem:[#allocation44_spill] sm:$0xff] }
  0x9a   :  { %2759 = vmatmul.mubr.msk.f32.gmra.mxu1 %vm339_vm1, %v178_v9 }
  0x9b   :  { %2857 = vmatmul.mubr.msk.f32.gmra.mxu0 %vm339_vm1, %v299_v38  ;;  %2761 = vmatprep.mubr.msk.f32.mxu1 %vm339_vm1, %v170_v15 }
  0x9c   :  { %2859 = vmatprep.mubr.msk.f32.mxu0 %vm339_vm1, %v291_v26 }
  0x9e   :  { %2762 = vmatmul.mubr.msk.f32.gmra.mxu1 %vm339_vm1, %v162_v17 }
  0x9f   :  { %2860 = vmatmul.mubr.msk.f32.gmra.mxu0 %vm339_vm1, %v283_v28  ;;  %2764 = vmatprep.mubr.msk.f32.mxu1 %vm339_vm1, %v154_v32 }
  0xa0   :  { %2862 = vmatprep.mubr.msk.f32.mxu0 %vm339_vm1, %v275_v27 }
  0xa2   :  { %2765 = vmatmul.mubr.msk.f32.gmra.mxu1 %vm339_vm1, %v146_v22 }
  0xa3   :  { %2863 = vmatmul.mubr.msk.f32.gmra.mxu0 %vm339_vm1, %v331_v8  ;;  %2767 = vmatprep.mubr.msk.f32.mxu1 %vm339_vm1, %v3497_v5  ;;  %v4855_v5 = vld [vmem:[#allocation21_spill] sm:$0xff] }
  0xa4   :  { %2865 = vmatprep.mubr.msk.f32.mxu0 %vm339_vm1, %v4849_v40 }
  0xa6   :  { %2768 = vmatmul.mubr.msk.f32.gmra.mxu1 %vm339_vm1, %v4850_v59 }
  0xa7   :  { %2866 = vmatmul.mubr.msk.f32.gmra.mxu0 %vm339_vm1, %v4851_v52  ;;  %2770 = vmatprep.mubr.msk.f32.mxu1 %vm339_vm1, %v4852_v12 }
  0xa8   :  { %2868 = vmatprep.mubr.msk.f32.mxu0 %vm339_vm1, %v4853_v48 }
  0xaa   :  { %2771 = vmatmul.mubr.msk.f32.gmra.mxu1 %vm339_vm1, %v4854_v14 }
  0xab   :  { %2869 = vmatmul.mubr.msk.f32.gmra.mxu0 %vm339_vm1, %v3565_v53  ;;  %2773 = vmatprep.mubr.msk.f32.mxu1 %vm339_vm1, %v4855_v5  ;;  %v4859_v53 = vld [vmem:[#allocation25_spill] sm:$0xff] }
  0xac   :  { %2871 = vmatprep.mubr.msk.f32.mxu0 %vm339_vm1, %v4856_v30 }
  0xae   :  { %2774 = vmatmul.mubr.msk.f32.gmra.mxu1 %vm339_vm1, %v4857_v34 }
  0xaf   :  { %2872 = vmatmul.mubr.msk.f32.gmra.mxu0 %vm339_vm1, %v3602_v60  ;;  %2776 = vmatprep.mubr.msk.f32.mxu1 %vm339_vm1, %v3610_v37  ;;  %v4863_v60 = vld [vmem:[#allocation29_spill] sm:$0xff]  ;;  %v4864_v37 = vld [vmem:[#allocation30_spill] sm:$0xff] }
  0xb0   :  { %2874 = vmatprep.mubr.msk.f32.mxu0 %vm339_vm1, %v3626_v62  ;;  %v4865_v62 = vld [vmem:[#allocation31_spill] sm:$0xff] }
  0xb2   :  { %2777 = vmatmul.mubr.msk.f32.gmra.mxu1 %vm339_vm1, %v4858_v20 }
  0xb3   :  { %2875 = vmatmul.mubr.msk.f32.gmra.mxu0 %vm339_vm1, %v4859_v53  ;;  %2779 = vmatprep.mubr.msk.f32.mxu1 %vm339_vm1, %v4860_v57 }
  0xb4   :  { %2877 = vmatprep.mubr.msk.f32.mxu0 %vm339_vm1, %v4861_v35 }
  0xb6   :  { %2780 = vmatmul.mubr.msk.f32.gmra.mxu1 %vm339_vm1, %v4862_v44 }
  0xb7   :  { %2878 = vmatmul.mubr.msk.f32.gmra.mxu0 %vm339_vm1, %v4863_v60  ;;  %2782 = vmatprep.mubr.msk.f32.mxu1 %vm339_vm1, %v4864_v37 }
  0xb8   :  { %2880 = vmatprep.mubr.msk.f32.mxu0 %vm339_vm1, %v3709_v58  ;;  %v4870_v58 = vld [vmem:[#allocation36_spill] sm:$0xff] }
  0xba   :  { %2783 = vmatmul.mubr.msk.f32.gmra.mxu1 %vm339_vm1, %v4865_v62 }
  0xbb   :  { %2881 = vmatmul.mubr.msk.f32.gmra.mxu0 %vm339_vm1, %v4866_v49  ;;  %2785 = vmatprep.mubr.msk.f32.mxu1 %vm339_vm1, %v4867_v16 }
  0xbc   :  { %2883 = vmatprep.mubr.msk.f32.mxu0 %vm339_vm1, %v3746_v11  ;;  %v4873_v11 = vld [vmem:[#allocation40_spill] sm:$0xff] }
  0xbe   :  { %2786 = vmatmul.mubr.msk.f32.gmra.mxu1 %vm339_vm1, %v4868_v4 }
  0xbf   :  { %2884 = vmatmul.mubr.msk.f32.gmra.mxu0 %vm339_vm1, %v3754_v23  ;;  %2788 = vmatprep.mubr.msk.f32.mxu1 %vm339_vm1, %v4869_v18  ;;  %v4875_v23 = vld [vmem:[#allocation41_spill] sm:$0xff] }
  0xc0   :  { %2886 = vmatprep.mubr.msk.f32.mxu0 %vm339_vm1, %v3780_v29  ;;  %v4877_v29 = vld [vmem:[#allocation43_spill] sm:$0xff] }
  0xc2   :  { %2789 = vmatmul.mubr.msk.f32.gmra.mxu1 %vm339_vm1, %v4870_v58 }
  0xc3   :  { %2887 = vmatmul.mubr.msk.f32.gmra.mxu0 %vm339_vm1, %v4871_v33  ;;  %2791 = vmatprep.mubr.msk.f32.mxu1 %vm339_vm1, %v4872_v6 }
  0xc4   :  { %2889 = vmatprep.mubr.msk.f32.mxu0 %vm339_vm1, %v4873_v11 }
  0xc6   :  { %2792 = vmatmul.mubr.msk.f32.gmra.mxu1 %vm339_vm1, %v4874_v2 }
  0xc7   :  { %2890 = vmatmul.mubr.msk.f32.gmra.mxu0 %vm339_vm1, %v4875_v23  ;;  %2794 = vmatprep.mubr.msk.f32.mxu1 %vm339_vm1, %v4876_v3 }
  0xc8   :  { %2892 = vmatprep.mubr.msk.f32.mxu0 %vm339_vm1, %v3856_v7  ;;  %v4881_v7 = vld [vmem:[#allocation46_spill] sm:$0xff] }
  0xca   :  { %2795 = vmatmul.mubr.msk.f32.gmra.mxu1 %vm339_vm1, %v4877_v29 }
  0xcb   :  { %2893 = vmatmul.mubr.msk.f32.gmra.mxu0 %vm339_vm1, %v3864_v21  ;;  %2797 = vmatprep.mubr.msk.f32.mxu1 %vm339_vm1, %v4878_v43  ;;  %v4880_v21 = vld [vmem:[#allocation47_spill] sm:$0xff] }
  0xcc   :  { %2895 = vmatprep.mubr.msk.f32.mxu0 %vm339_vm1, %v3888_v31  ;;  %v4883_v31 = vld [vmem:[#allocation49_spill] sm:$0xff] }
  0xce   :  { %2798 = vmatmul.mubr.msk.f32.gmra.mxu1 %vm339_vm1, %v3880_v19  ;;  %v4882_v19 = vld [vmem:[#allocation48_spill] sm:$0xff] }
  0xcf   :  { %2896 = vmatmul.mubr.msk.f32.gmra.mxu0 %vm339_vm1, %v3896_v1  ;;  %2800 = vmatprep.mubr.msk.f32.mxu1 %vm339_vm1, %v4879_v24  ;;  %v4441_v1 = vpop.f32.mrf.mxu1 }
  0xd0   :  { %2898 = vmatprep.mubr.msk.f32.mxu0 %vm339_vm1, %v3922_v46 }
  0xd1   :  { %v4445_v46 = vpop.f32.mrf.mxu1 }
  0xd2   :  { %2801 = vmatmul.mubr.msk.f32.gmra.mxu1 %vm339_vm1, %v3914_v25  ;;  %v4443_v25 = vpop.f32.mrf.mxu0 }
  0xd3   :  { %2899 = vmatmul.mubr.msk.f32.gmra.mxu0 %vm339_vm1, %v3930_v54  ;;  %2803 = vmatprep.mubr.msk.f32.mxu1 %vm339_vm1, %v3936_v63  ;;  %v4449_v63 = vpop.f32.mrf.mxu1 }
  0xd4   :  { %2901 = vmatprep.mubr.msk.f32.mxu0 %vm339_vm1, %v4880_v21  ;;  %v4447_v54 = vpop.f32.mrf.mxu0 }
  0xd6   :  { %2804 = vmatmul.mubr.msk.f32.gmra.mxu1 %vm339_vm1, %v4881_v7 }
  0xd7   :  { %2902 = vmatmul.mubr.msk.f32.gmra.mxu0 %vm339_vm1, %v3965_v13  ;;  %2806 = vmatprep.mubr.msk.f32.mxu1 %vm339_vm1, %v4882_v19  ;;  %v4451_v13 = vpop.f32.mrf.mxu0 }
  0xd8   :  { %2904 = vmatprep.mubr.msk.f32.mxu0 %vm339_vm1, %v3991_v41  ;;  %v4453_v41 = vpop.f32.mrf.mxu1 }
  0xda   :  { %2807 = vmatmul.mubr.msk.f32.gmra.mxu1 %vm339_vm1, %v4883_v31 }
  0xdb   :  { %2905 = vmatmul.mubr.msk.f32.gmra.mxu0 %vm339_vm1, %v3999_v42  ;;  %2809 = vmatprep.mubr.msk.f32.mxu1 %vm339_vm1, %v4007_v47  ;;  %v4455_v42 = vpop.f32.mrf.mxu0  ;;  %v4457_v47 = vpop.f32.mrf.mxu1 }
  0xdc   :  { %2907 = vmatprep.mubr.msk.f32.mxu0 %vm339_vm1, %v4023_v36 }
  0xdd   :  { %v4461_v36 = vpop.f32.mrf.mxu1 }
  0xde   :  { %2810 = vmatmul.mubr.msk.f32.gmra.mxu1 %vm339_vm1, %v4015_v56  ;;  %v4459_v56 = vpop.f32.mrf.mxu0 }
  0xdf   :  { %2908 = vmatmul.mubr.msk.f32.gmra.mxu0 %vm339_vm1, %v4031_v61  ;;  %2812 = vmatprep.mubr.msk.f32.mxu1 %vm339_vm1, %v4041_v50  ;;  %v4465_v50 = vpop.f32.mrf.mxu1 }
  0xe0   :  { %2910 = vmatprep.mubr.msk.f32.mxu0 %vm339_vm1, %v4053_v39  ;;  %v4463_v61 = vpop.f32.mrf.mxu0 }
  0xe1   :  { %v4469_v39 = vpop.f32.mrf.mxu1 }
  0xe2   :  { %2813 = vmatmul.mubr.msk.f32.gmra.mxu1 %vm339_vm1, %v4047_v55  ;;  %v4467_v55 = vpop.f32.mrf.mxu0 }
  0xe3   :  { %2911 = vmatmul.mubr.msk.f32.gmra.mxu0 %vm339_vm1, %v4059_v51  ;;  %v4473_v9 = vpop.f32.mrf.mxu1 }
  0xe4   :  { %v4471_v51 = vpop.f32.mrf.mxu0 }
  0xe5   :  { %v4477_v10 = vpop.f32.mrf.mxu1 }
  0xe6   :  { %v4475_v45 = vpop.f32.mrf.mxu0 }
  0xe7   :  { %v4481_v15 = vpop.f32.mrf.mxu1 }
  0xe8   :  { %v4479_v38 = vpop.f32.mrf.mxu0 }
  0xe9   :  { %v4485_v26 = vpop.f32.mrf.mxu1 }
  0xea   :  { %v4483_v0 = vpop.f32.mrf.mxu0 }
  0xeb   :  { %v4489_v28 = vpop.f32.mrf.mxu1 }
  0xec   :  { %v4487_v17 = vpop.f32.mrf.mxu0 }
  0xed   :  { %v4493_v27 = vpop.f32.mrf.mxu1 }
  0xee   :  { %v4491_v32 = vpop.f32.mrf.mxu0 }
  0xef   :  { %v4497_v8 = vpop.f32.mrf.mxu1 }
  0xf0   :  { %v4495_v22 = vpop.f32.mrf.mxu0 }
  0xf1   :  { %v4501_v59 = vpop.f32.mrf.mxu1 }
  0xf2   :  { %v4499_v40 = vpop.f32.mrf.mxu0 }
  0xf3   :  { %v4505_v12 = vpop.f32.mrf.mxu1 }
  0xf4   :  { %v4503_v52 = vpop.f32.mrf.mxu0  ;;  %4884 = vst [vmem:[#allocation5_spill] sm:$0xff] %v4505_v12 }
  0xf5   :  { %v4509_v14 = vpop.f32.mrf.mxu1 }
  0xf6   :  { %v4507_v48 = vpop.f32.mrf.mxu0  ;;  %4885 = vst [vmem:[#allocation6_spill] sm:$0xff] %v4509_v14 }
  0xf7   :  { %v4513_v30 = vpop.f32.mrf.mxu1 }
  0xf8   :  { %v4511_v5 = vpop.f32.mrf.mxu0  ;;  %4886 = vst [vmem:[#allocation13_spill] sm:$0xff] %v4513_v30 }
  0xf9   :  { %v4517_v20 = vpop.f32.mrf.mxu1 }
  0xfa   :  { %v4515_v34 = vpop.f32.mrf.mxu0  ;;  %4887 = vst [vmem:[#allocation7_spill] sm:$0xff] %v4517_v20 }
  0xfb   :  { %v4521_v57 = vpop.f32.mrf.mxu1 }
  0xfc   :  { %v4519_v53 = vpop.f32.mrf.mxu0  ;;  %4888 = vst [vmem:[#allocation8_spill] sm:$0xff] %v4521_v57 }
  0xfd   :  { %v4525_v44 = vpop.f32.mrf.mxu1 }
  0xfe   :  { %v4523_v35 = vpop.f32.mrf.mxu0  ;;  %4889 = vst [vmem:[#allocation9_spill] sm:$0xff] %v4525_v44 }
  0xff   :  { %v4529_v37 = vpop.f32.mrf.mxu1 }
 0x100   :  { %v4527_v60 = vpop.f32.mrf.mxu0  ;;  %4890 = vst [vmem:[#allocation10_spill] sm:$0xff] %v4529_v37 }
 0x101   :  { %v4533_v49 = vpop.f32.mrf.mxu1 }
 0x102   :  { %v4531_v62 = vpop.f32.mrf.mxu0  ;;  %4891 = vst [vmem:[#allocation11_spill] sm:$0xff] %v4533_v49 }
 0x103   :  { %v4537_v4 = vpop.f32.mrf.mxu1 }
 0x104   :  { %v4535_v16 = vpop.f32.mrf.mxu0  ;;  %4892 = vst [vmem:[#allocation12_spill] sm:$0xff] %v4537_v4 }
 0x105   :  { %v4541_v58 = vpop.f32.mrf.mxu1 }
 0x106   :  { %v4539_v18 = vpop.f32.mrf.mxu0  ;;  %4893 = vst [vmem:[#allocation14_spill] sm:$0xff] %v4541_v58 }
 0x107   :  { %v4545_v6 = vpop.f32.mrf.mxu1 }
 0x108   :  { %v4543_v33 = vpop.f32.mrf.mxu0  ;;  %4894 = vst [vmem:[#allocation16_spill] sm:$0xff] %v4545_v6 }
 0x109   :  { %v4549_v2 = vpop.f32.mrf.mxu1 }
 0x10a   :  { %v4547_v11 = vpop.f32.mrf.mxu0  ;;  %4895 = vst [vmem:[#allocation15_spill] sm:$0xff] %v4549_v2 }
 0x10b   :  { %v4553_v3 = vpop.f32.mrf.mxu1 }
 0x10c   :  { %v4551_v23 = vpop.f32.mrf.mxu0  ;;  %4896 = vst [vmem:[#allocation17_spill] sm:$0xff] %v4553_v3 }
 0x10d   :  { %v4557_v43 = vpop.f32.mrf.mxu1 }
 0x10e   :  { %v4555_v29 = vpop.f32.mrf.mxu0  ;;  %4897 = vst [vmem:[#allocation18_spill] sm:$0xff] %v4557_v43 }
 0x10f   :  { %v4561_v21 = vpop.f32.mrf.mxu1 }
 0x110   :  { %v4559_v24 = vpop.f32.mrf.mxu0  ;;  %4898 = vst [vmem:[#allocation20_spill] sm:$0xff] %v4561_v21 }
 0x111   :  { %v4565_v19 = vpop.f32.mrf.mxu1 }
 0x112   :  { %4899 = vst [vmem:[#allocation19_spill] sm:$0xff] %v4565_v19 }
 0x113   :  { %v4563_v7 = vpop.f32.mrf.mxu0  ;;  %v2721_v6 = vpop.f32.mrf.mxu1 }
 0x114   :  { %v1188_v2 = vadd.f32 %v2721_v6, %v4443_v25 }
 0x115   :  { %v4567_v31 = vpop.f32.mrf.mxu0  ;;  %v1182_v4 = vpop.f32.mrf.mxu1 }
 0x116   :  { %v1183_v49 = vadd.f32 %v1182_v4, %v4447_v54 }
 0x117   :  { %v2819_v58 = vpop.f32.mrf.mxu0 }
 0x118   :  { %v2084_v3 = vadd.f32 %v2819_v58, %v1188_v2 }
 0x119   :  { %v1764_v37 = vpop.f32.mrf.mxu0 }
 0x11a   :  { %2148 = vst [vmem:[#allocation2 + $0x8] sm:$0xff] %v2084_v3  ;;  %v2083_v44 = vadd.f32 %v1764_v37, %v1183_v49 }
 0x11c   :  { %2147 = vst [vmem:[#allocation2] sm:$0xff] %v2083_v44 }
 0x12a   :  { %v2724_v43 = vpop.f32.mrf.mxu1 }
 0x12b   :  { %v1198_v21 = vadd.f32 %v2724_v43, %v4451_v13  ;;  %v2822_v57 = vpop.f32.mrf.mxu0 }
 0x12c   :  { %v1192_v20 = vpop.f32.mrf.mxu1 }
 0x12d   :  { %v2086_v19 = vadd.f32 %v2822_v57, %v1198_v21  ;;  %v1193_v30 = vadd.f32 %v1192_v20, %v4455_v42  ;;  %v1774_v14 = vpop.f32.mrf.mxu0 }
 0x12e   :  { %v2727_v12 = vpop.f32.mrf.mxu1 }
 0x12f   :  { %2150 = vst [vmem:[#allocation2 + $0x18] sm:$0xff] %v2086_v19  ;;  %v2085_v25 = vadd.f32 %v1774_v14, %v1193_v30  ;;  %v1208_v58 = vadd.f32 %v2727_v12, %v4459_v56  ;;  %v2825_v6 = vpop.f32.mrf.mxu0 }
 0x130   :  { %v1202_v54 = vpop.f32.mrf.mxu1 }
 0x131   :  { %2149 = vst [vmem:[#allocation2 + $0x10] sm:$0xff] %v2085_v25  ;;  %v2088_v4 = vadd.f32 %v2825_v6, %v1208_v58  ;;  %v1203_v37 = vadd.f32 %v1202_v54, %v4463_v61  ;;  %v1784_v49 = vpop.f32.mrf.mxu0 }
 0x132   :  { %v2730_v13 = vpop.f32.mrf.mxu1 }
 0x133   :  { %2152 = vst [vmem:[#allocation2 + $0x28] sm:$0xff] %v2088_v4  ;;  %v2087_v2 = vadd.f32 %v1784_v49, %v1203_v37  ;;  %v1218_v57 = vadd.f32 %v2730_v13, %v4467_v55  ;;  %v2828_v44 = vpop.f32.mrf.mxu0 }
 0x134   :  { %v1212_v42 = vpop.f32.mrf.mxu1 }
 0x135   :  { %2151 = vst [vmem:[#allocation2 + $0x20] sm:$0xff] %v2087_v2  ;;  %v2090_v20 = vadd.f32 %v2828_v44, %v1218_v57  ;;  %v1213_v14 = vadd.f32 %v1212_v42, %v4471_v51  ;;  %v1794_v30 = vpop.f32.mrf.mxu0 }
 0x136   :  { %v2733_v56 = vpop.f32.mrf.mxu1 }
 0x137   :  { %2154 = vst [vmem:[#allocation2 + $0x38] sm:$0xff] %v2090_v20  ;;  %v2089_v12 = vadd.f32 %v1794_v30, %v1213_v14  ;;  %v1228_v3 = vadd.f32 %v2733_v56, %v4475_v45  ;;  %v2831_v43 = vpop.f32.mrf.mxu0 }
 0x138   :  { %v1222_v61 = vpop.f32.mrf.mxu1 }
 0x139   :  { %2153 = vst [vmem:[#allocation2 + $0x30] sm:$0xff] %v2089_v12  ;;  %v2092_v21 = vadd.f32 %v2831_v43, %v1228_v3  ;;  %v1223_v19 = vadd.f32 %v1222_v61, %v4479_v38  ;;  %v1804_v25 = vpop.f32.mrf.mxu0 }
 0x13a   :  { %v2736_v55 = vpop.f32.mrf.mxu1 }
 0x13b   :  { %2156 = vst [vmem:[#allocation2 + $0x48] sm:$0xff] %v2092_v21  ;;  %v2091_v58 = vadd.f32 %v1804_v25, %v1223_v19  ;;  %v1238_v6 = vadd.f32 %v2736_v55, %v4483_v0  ;;  %v2834_v54 = vpop.f32.mrf.mxu0 }
 0x13c   :  { %v1232_v51 = vpop.f32.mrf.mxu1 }
 0x13d   :  { %2155 = vst [vmem:[#allocation2 + $0x40] sm:$0xff] %v2091_v58  ;;  %v2094_v4 = vadd.f32 %v2834_v54, %v1238_v6  ;;  %v1233_v37 = vadd.f32 %v1232_v51, %v4487_v17  ;;  %v1814_v49 = vpop.f32.mrf.mxu0 }
 0x13e   :  { %v2739_v45 = vpop.f32.mrf.mxu1 }
 0x13f   :  { %2158 = vst [vmem:[#allocation2 + $0x58] sm:$0xff] %v2094_v4  ;;  %v2093_v13 = vadd.f32 %v1814_v49, %v1233_v37  ;;  %v1248_v2 = vadd.f32 %v2739_v45, %v4491_v32  ;;  %v2837_v57 = vpop.f32.mrf.mxu0 }
 0x140   :  { %v1242_v38 = vpop.f32.mrf.mxu1 }
 0x141   :  { %2157 = vst [vmem:[#allocation2 + $0x50] sm:$0xff] %v2093_v13  ;;  %v2096_v44 = vadd.f32 %v2837_v57, %v1248_v2  ;;  %v1243_v42 = vadd.f32 %v1242_v38, %v4495_v22  ;;  %v1824_v20 = vpop.f32.mrf.mxu0 }
 0x142   :  { %v2742_v0 = vpop.f32.mrf.mxu1 }
 0x143   :  { %2160 = vst [vmem:[#allocation2 + $0x68] sm:$0xff] %v2096_v44  ;;  %v2095_v14 = vadd.f32 %v1824_v20, %v1243_v42  ;;  %v1258_v30 = vadd.f32 %v2742_v0, %v4499_v40  ;;  %v2840_v56 = vpop.f32.mrf.mxu0 }
 0x144   :  { %v1252_v17 = vpop.f32.mrf.mxu1 }
 0x145   :  { %2159 = vst [vmem:[#allocation2 + $0x60] sm:$0xff] %v2095_v14  ;;  %v2098_v12 = vadd.f32 %v2840_v56, %v1258_v30  ;;  %v1253_v3 = vadd.f32 %v1252_v17, %v4503_v52  ;;  %v1834_v43 = vpop.f32.mrf.mxu0 }
 0x146   :  { %v2745_v32 = vpop.f32.mrf.mxu1 }
 0x147   :  { %2162 = vst [vmem:[#allocation2 + $0x78] sm:$0xff] %v2098_v12  ;;  %v2097_v61 = vadd.f32 %v1834_v43, %v1253_v3  ;;  %v1268_v21 = vadd.f32 %v2745_v32, %v4507_v48  ;;  %v2843_v19 = vpop.f32.mrf.mxu0 }
 0x148   :  { %v1262_v22 = vpop.f32.mrf.mxu1 }
 0x149   :  { %2161 = vst [vmem:[#allocation2 + $0x70] sm:$0xff] %v2097_v61  ;;  %v2100_v25 = vadd.f32 %v2843_v19, %v1268_v21  ;;  %v1263_v55 = vadd.f32 %v1262_v22, %v4511_v5  ;;  %v1844_v58 = vpop.f32.mrf.mxu0 }
 0x14a   :  { %v2748_v40 = vpop.f32.mrf.mxu1 }
 0x14b   :  { %2164 = vst [vmem:[#allocation2 + $0x88] sm:$0xff] %v2100_v25  ;;  %v2099_v6 = vadd.f32 %v1844_v58, %v1263_v55  ;;  %v1278_v54 = vadd.f32 %v2748_v40, %v4515_v34  ;;  %v2846_v51 = vpop.f32.mrf.mxu0 }
 0x14c   :  { %v1272_v52 = vpop.f32.mrf.mxu1 }
 0x14d   :  { %2163 = vst [vmem:[#allocation2 + $0x80] sm:$0xff] %v2099_v6  ;;  %v2102_v4 = vadd.f32 %v2846_v51, %v1278_v54  ;;  %v1273_v37 = vadd.f32 %v1272_v52, %v4519_v53  ;;  %v1854_v49 = vpop.f32.mrf.mxu0 }
 0x14e   :  { %v2751_v48 = vpop.f32.mrf.mxu1 }
 0x14f   :  { %2166 = vst [vmem:[#allocation2 + $0x98] sm:$0xff] %v2102_v4  ;;  %v2101_v45 = vadd.f32 %v1854_v49, %v1273_v37  ;;  %v1288_v13 = vadd.f32 %v2751_v48, %v4523_v35  ;;  %v2849_v2 = vpop.f32.mrf.mxu0 }
 0x150   :  { %v1282_v5 = vpop.f32.mrf.mxu1 }
 0x151   :  { %2165 = vst [vmem:[#allocation2 + $0x90] sm:$0xff] %v2101_v45  ;;  %v2104_v57 = vadd.f32 %v2849_v2, %v1288_v13  ;;  %v1283_v38 = vadd.f32 %v1282_v5, %v4527_v60  ;;  %v1864_v44 = vpop.f32.mrf.mxu0 }
 0x152   :  { %v2754_v34 = vpop.f32.mrf.mxu1 }
 0x153   :  { %2168 = vst [vmem:[#allocation2 + $0xa8] sm:$0xff] %v2104_v57  ;;  %v2103_v42 = vadd.f32 %v1864_v44, %v1283_v38  ;;  %v1298_v20 = vadd.f32 %v2754_v34, %v4531_v62  ;;  %v2852_v0 = vpop.f32.mrf.mxu0 }
 0x154   :  { %v1292_v53 = vpop.f32.mrf.mxu1 }
 0x155   :  { %2167 = vst [vmem:[#allocation2 + $0xa0] sm:$0xff] %v2103_v42  ;;  %v2106_v14 = vadd.f32 %v2852_v0, %v1298_v20  ;;  %v1293_v30 = vadd.f32 %v1292_v53, %v4535_v16  ;;  %v1874_v56 = vpop.f32.mrf.mxu0 }
 0x156   :  { %v2757_v35 = vpop.f32.mrf.mxu1 }
 0x157   :  { %2170 = vst [vmem:[#allocation2 + $0xb8] sm:$0xff] %v2106_v14  ;;  %v2105_v17 = vadd.f32 %v1874_v56, %v1293_v30  ;;  %v1308_v12 = vadd.f32 %v2757_v35, %v4539_v18  ;;  %v2855_v3 = vpop.f32.mrf.mxu0 }
 0x158   :  { %v1302_v60 = vpop.f32.mrf.mxu1 }
 0x159   :  { %2169 = vst [vmem:[#allocation2 + $0xb0] sm:$0xff] %v2105_v17  ;;  %v2108_v43 = vadd.f32 %v2855_v3, %v1308_v12  ;;  %v1303_v32 = vadd.f32 %v1302_v60, %v4543_v33  ;;  %v1884_v61 = vpop.f32.mrf.mxu0 }
 0x15a   :  { %v2760_v62 = vpop.f32.mrf.mxu1 }
 0x15b   :  { %2172 = vst [vmem:[#allocation2 + $0xc8] sm:$0xff] %v2108_v43  ;;  %v2107_v21 = vadd.f32 %v1884_v61, %v1303_v32  ;;  %v1318_v19 = vadd.f32 %v2760_v62, %v4547_v11  ;;  %v2858_v22 = vpop.f32.mrf.mxu0 }
 0x15c   :  { %v1312_v16 = vpop.f32.mrf.mxu1 }
 0x15d   :  { %2171 = vst [vmem:[#allocation2 + $0xc0] sm:$0xff] %v2107_v21  ;;  %v2110_v25 = vadd.f32 %v2858_v22, %v1318_v19  ;;  %v1313_v55 = vadd.f32 %v1312_v16, %v4551_v23  ;;  %v1894_v58 = vpop.f32.mrf.mxu0 }
 0x15e   :  { %v2763_v18 = vpop.f32.mrf.mxu1 }
 0x15f   :  { %2174 = vst [vmem:[#allocation2 + $0xd8] sm:$0xff] %v2110_v25  ;;  %v2109_v40 = vadd.f32 %v1894_v58, %v1313_v55  ;;  %v1328_v6 = vadd.f32 %v2763_v18, %v4555_v29  ;;  %v2861_v54 = vpop.f32.mrf.mxu0 }
 0x160   :  { %v1322_v33 = vpop.f32.mrf.mxu1 }
 0x161   :  { %2173 = vst [vmem:[#allocation2 + $0xd0] sm:$0xff] %v2109_v40  ;;  %v2112_v51 = vadd.f32 %v2861_v54, %v1328_v6  ;;  %v1323_v52 = vadd.f32 %v1322_v33, %v4559_v24  ;;  %v1904_v4 = vpop.f32.mrf.mxu0 }
 0x162   :  { %v2766_v11 = vpop.f32.mrf.mxu1 }
 0x163   :  { %2176 = vst [vmem:[#allocation2 + $0xe8] sm:$0xff] %v2112_v51  ;;  %v2111_v37 = vadd.f32 %v1904_v4, %v1323_v52  ;;  %v1338_v49 = vadd.f32 %v2766_v11, %v4563_v7  ;;  %v2864_v48 = vpop.f32.mrf.mxu0 }
 0x164   :  { %v1332_v23 = vpop.f32.mrf.mxu1 }
 0x165   :  { %2175 = vst [vmem:[#allocation2 + $0xe0] sm:$0xff] %v2111_v37  ;;  %v2114_v45 = vadd.f32 %v2864_v48, %v1338_v49  ;;  %v1333_v13 = vadd.f32 %v1332_v23, %v4567_v31  ;;  %v1914_v2 = vpop.f32.mrf.mxu0 }
 0x166   :  { %v2769_v29 = vpop.f32.mrf.mxu1 }
 0x167   :  { %2178 = vst [vmem:[#allocation2 + $0xf8] sm:$0xff] %v2114_v45  ;;  %v2113_v5 = vadd.f32 %v1914_v2, %v1333_v13  ;;  %v1348_v57 = vadd.f32 %v2769_v29, %v4441_v1  ;;  %v2867_v38 = vpop.f32.mrf.mxu0 }
 0x168   :  { %v1342_v24 = vpop.f32.mrf.mxu1 }
 0x169   :  { %2177 = vst [vmem:[#allocation2 + $0xf0] sm:$0xff] %v2113_v5  ;;  %v2116_v44 = vadd.f32 %v2867_v38, %v1348_v57  ;;  %v1343_v34 = vadd.f32 %v1342_v24, %v4445_v46  ;;  %v1924_v42 = vpop.f32.mrf.mxu0 }
 0x16a   :  { %v2772_v7 = vpop.f32.mrf.mxu1 }
 0x16b   :  { %2180 = vst [vmem:[#allocation2 + $0x108] sm:$0xff] %v2116_v44  ;;  %v2115_v20 = vadd.f32 %v1924_v42, %v1343_v34  ;;  %v1358_v0 = vadd.f32 %v2772_v7, %v4449_v63  ;;  %v2870_v53 = vpop.f32.mrf.mxu0  ;;  %v4900_v44 = vld [vmem:[#allocation5_spill] sm:$0xff] }
 0x16c   :  { %v1352_v31 = vpop.f32.mrf.mxu1 }
 0x16d   :  { %2179 = vst [vmem:[#allocation2 + $0x100] sm:$0xff] %v2115_v20  ;;  %v2118_v14 = vadd.f32 %v2870_v53, %v1358_v0  ;;  %v1353_v30 = vadd.f32 %v1352_v31, %v4453_v41  ;;  %v1934_v56 = vpop.f32.mrf.mxu0  ;;  %v4901_v20 = vld [vmem:[#allocation6_spill] sm:$0xff] }
 0x16e   :  { %v2775_v1 = vpop.f32.mrf.mxu1 }
 0x16f   :  { %2182 = vst [vmem:[#allocation2 + $0x118] sm:$0xff] %v2118_v14  ;;  %v2117_v35 = vadd.f32 %v1934_v56, %v1353_v30  ;;  %v1368_v17 = vadd.f32 %v2775_v1, %v4457_v47  ;;  %v2873_v12 = vpop.f32.mrf.mxu0  ;;  %v4902_v14 = vld [vmem:[#allocation13_spill] sm:$0xff] }
 0x170   :  { %v1362_v46 = vpop.f32.mrf.mxu1 }
 0x171   :  { %2181 = vst [vmem:[#allocation2 + $0x110] sm:$0xff] %v2117_v35  ;;  %v2120_v3 = vadd.f32 %v2873_v12, %v1368_v17  ;;  %v1363_v60 = vadd.f32 %v1362_v46, %v4461_v36  ;;  %v1944_v43 = vpop.f32.mrf.mxu0  ;;  %v4903_v35 = vld [vmem:[#allocation7_spill] sm:$0xff] }
 0x172   :  { %v2778_v63 = vpop.f32.mrf.mxu1 }
 0x173   :  { %2184 = vst [vmem:[#allocation2 + $0x128] sm:$0xff] %v2120_v3  ;;  %v2119_v32 = vadd.f32 %v1944_v43, %v1363_v60  ;;  %v1378_v61 = vadd.f32 %v2778_v63, %v4465_v50  ;;  %v2876_v62 = vpop.f32.mrf.mxu0  ;;  %v4904_v60 = vld [vmem:[#allocation8_spill] sm:$0xff] }
 0x174   :  { %v1372_v41 = vpop.f32.mrf.mxu1 }
 0x175   :  { %2183 = vst [vmem:[#allocation2 + $0x120] sm:$0xff] %v2119_v32  ;;  %v2122_v21 = vadd.f32 %v2876_v62, %v1378_v61  ;;  %v1373_v19 = vadd.f32 %v1372_v41, %v4469_v39  ;;  %v1954_v22 = vpop.f32.mrf.mxu0  ;;  %v4905_v62 = vld [vmem:[#allocation9_spill] sm:$0xff] }
 0x176   :  { %v2781_v47 = vpop.f32.mrf.mxu1 }
 0x177   :  { %2186 = vst [vmem:[#allocation2 + $0x138] sm:$0xff] %v2122_v21  ;;  %v2121_v16 = vadd.f32 %v1954_v22, %v1373_v19  ;;  %v1388_v25 = vadd.f32 %v2781_v47, %v4473_v9  ;;  %v2879_v55 = vpop.f32.mrf.mxu0  ;;  %v4906_v47 = vld [vmem:[#allocation10_spill] sm:$0xff] }
 0x178   :  { %v1382_v36 = vpop.f32.mrf.mxu1 }
 0x179   :  { %2185 = vst [vmem:[#allocation2 + $0x130] sm:$0xff] %v2121_v16  ;;  %v2124_v58 = vadd.f32 %v2879_v55, %v1388_v25  ;;  %v1383_v18 = vadd.f32 %v1382_v36, %v4477_v10  ;;  %v1964_v40 = vpop.f32.mrf.mxu0 }
 0x17a   :  { %v2784_v50 = vpop.f32.mrf.mxu1 }
 0x17b   :  { %2188 = vst [vmem:[#allocation2 + $0x148] sm:$0xff] %v2124_v58  ;;  %v2123_v6 = vadd.f32 %v1964_v40, %v1383_v18  ;;  %v1398_v54 = vadd.f32 %v2784_v50, %v4481_v15  ;;  %v2882_v33 = vpop.f32.mrf.mxu0  ;;  %v4907_v58 = vld [vmem:[#allocation11_spill] sm:$0xff] }
 0x17c   :  { %v1392_v39 = vpop.f32.mrf.mxu1 }
 0x17d   :  { %2187 = vst [vmem:[#allocation2 + $0x140] sm:$0xff] %v2123_v6  ;;  %v2126_v51 = vadd.f32 %v2882_v33, %v1398_v54  ;;  %v1393_v52 = vadd.f32 %v1392_v39, %v4485_v26  ;;  %v1974_v4 = vpop.f32.mrf.mxu0  ;;  %v4908_v54 = vld [vmem:[#allocation12_spill] sm:$0xff] }
 0x17e   :  { %v2787_v9 = vpop.f32.mrf.mxu1 }
 0x17f   :  { %2190 = vst [vmem:[#allocation2 + $0x158] sm:$0xff] %v2126_v51  ;;  %v2125_v11 = vadd.f32 %v1974_v4, %v1393_v52  ;;  %v1408_v37 = vadd.f32 %v2787_v9, %v4489_v28  ;;  %v2885_v49 = vpop.f32.mrf.mxu0  ;;  %v4909_v4 = vld [vmem:[#allocation14_spill] sm:$0xff] }
 0x180   :  { %v1402_v10 = vpop.f32.mrf.mxu1 }
 0x181   :  { %2189 = vst [vmem:[#allocation2 + $0x150] sm:$0xff] %v2125_v11  ;;  %v2128_v48 = vadd.f32 %v2885_v49, %v1408_v37  ;;  %v1403_v23 = vadd.f32 %v1402_v10, %v4493_v27  ;;  %v1984_v45 = vpop.f32.mrf.mxu0  ;;  %v4910_v10 = vld [vmem:[#allocation16_spill] sm:$0xff] }
 0x182   :  { %v2790_v15 = vpop.f32.mrf.mxu1 }
 0x183   :  { %2192 = vst [vmem:[#allocation2 + $0x168] sm:$0xff] %v2128_v48  ;;  %v2127_v13 = vadd.f32 %v1984_v45, %v1403_v23  ;;  %v1418_v2 = vadd.f32 %v2790_v15, %v4497_v8  ;;  %v2888_v29 = vpop.f32.mrf.mxu0 }
 0x184   :  { %v1412_v26 = vpop.f32.mrf.mxu1 }
 0x185   :  { %2191 = vst [vmem:[#allocation2 + $0x160] sm:$0xff] %v2127_v13  ;;  %v2130_v5 = vadd.f32 %v2888_v29, %v1418_v2  ;;  %v1413_v57 = vadd.f32 %v1412_v26, %v4501_v59  ;;  %v1994_v38 = vpop.f32.mrf.mxu0  ;;  %v4911_v13 = vld [vmem:[#allocation15_spill] sm:$0xff] }
 0x186   :  { %v2793_v28 = vpop.f32.mrf.mxu1 }
 0x187   :  { %2194 = vst [vmem:[#allocation2 + $0x178] sm:$0xff] %v2130_v5  ;;  %v2129_v24 = vadd.f32 %v1994_v38, %v1413_v57  ;;  %v1428_v34 = vadd.f32 %v2793_v28, %v4900_v44  ;;  %v2891_v42 = vpop.f32.mrf.mxu0  ;;  %v4912_v57 = vld [vmem:[#allocation17_spill] sm:$0xff] }
 0x188   :  { %v1422_v27 = vpop.f32.mrf.mxu1 }
 0x189   :  { %2193 = vst [vmem:[#allocation2 + $0x170] sm:$0xff] %v2129_v24  ;;  %v2132_v7 = vadd.f32 %v2891_v42, %v1428_v34  ;;  %v1423_v0 = vadd.f32 %v1422_v27, %v4901_v20  ;;  %v2004_v53 = vpop.f32.mrf.mxu0  ;;  %v4913_v34 = vld [vmem:[#allocation18_spill] sm:$0xff] }
 0x18a   :  { %v2796_v8 = vpop.f32.mrf.mxu1 }
 0x18b   :  { %2196 = vst [vmem:[#allocation2 + $0x188] sm:$0xff] %v2132_v7  ;;  %v2131_v31 = vadd.f32 %v2004_v53, %v1423_v0  ;;  %v1438_v30 = vadd.f32 %v2796_v8, %v4902_v14  ;;  %v2894_v56 = vpop.f32.mrf.mxu0  ;;  %v4914_v0 = vld [vmem:[#allocation20_spill] sm:$0xff] }
 0x18c   :  { %v1432_v59 = vpop.f32.mrf.mxu1 }
 0x18d   :  { %2195 = vst [vmem:[#allocation2 + $0x180] sm:$0xff] %v2131_v31  ;;  %v2134_v1 = vadd.f32 %v2894_v56, %v1438_v30  ;;  %v1433_v17 = vadd.f32 %v1432_v59, %v4903_v35  ;;  %v2014_v12 = vpop.f32.mrf.mxu0  ;;  %v4915_v30 = vld [vmem:[#allocation19_spill] sm:$0xff] }
 0x18e   :  { %v2799_v46 = vpop.f32.mrf.mxu1 }
 0x18f   :  { %2198 = vst [vmem:[#allocation2 + $0x198] sm:$0xff] %v2134_v1  ;;  %v2133_v3 = vadd.f32 %v2014_v12, %v1433_v17  ;;  %v1448_v43 = vadd.f32 %v2799_v46, %v4904_v60  ;;  %v2897_v63 = vpop.f32.mrf.mxu0 }
 0x190   :  { %v1442_v32 = vpop.f32.mrf.mxu1 }
 0x191   :  { %2197 = vst [vmem:[#allocation2 + $0x190] sm:$0xff] %v2133_v3  ;;  %v2136_v61 = vadd.f32 %v2897_v63, %v1448_v43  ;;  %v1443_v41 = vadd.f32 %v1442_v32, %v4905_v62  ;;  %v2024_v21 = vpop.f32.mrf.mxu0 }
 0x192   :  { %v2802_v19 = vpop.f32.mrf.mxu1 }
 0x193   :  { %2200 = vst [vmem:[#allocation2 + $0x1a8] sm:$0xff] %v2136_v61  ;;  %v2135_v22 = vadd.f32 %v2024_v21, %v1443_v41  ;;  %v1458_v16 = vadd.f32 %v2802_v19, %v4906_v47  ;;  %v2900_v25 = vpop.f32.mrf.mxu0 }
 0x194   :  { %v1452_v55 = vpop.f32.mrf.mxu1 }
 0x195   :  { %2199 = vst [vmem:[#allocation2 + $0x1a0] sm:$0xff] %v2135_v22  ;;  %v2138_v36 = vadd.f32 %v2900_v25, %v1458_v16  ;;  %v1453_v18 = vadd.f32 %v1452_v55, %v4907_v58  ;;  %v2034_v40 = vpop.f32.mrf.mxu0 }
 0x196   :  { %v2805_v50 = vpop.f32.mrf.mxu1 }
 0x197   :  { %2202 = vst [vmem:[#allocation2 + $0x1b8] sm:$0xff] %v2138_v36  ;;  %v2137_v6 = vadd.f32 %v2034_v40, %v1453_v18  ;;  %v1468_v33 = vadd.f32 %v2805_v50, %v4908_v54  ;;  %v2903_v39 = vpop.f32.mrf.mxu0 }
 0x198   :  { %v1462_v51 = vpop.f32.mrf.mxu1 }
 0x199   :  { %2201 = vst [vmem:[#allocation2 + $0x1b0] sm:$0xff] %v2137_v6  ;;  %v2140_v52 = vadd.f32 %v2903_v39, %v1468_v33  ;;  %v1463_v9 = vadd.f32 %v1462_v51, %v4909_v4  ;;  %v2044_v11 = vpop.f32.mrf.mxu0 }
 0x19a   :  { %v2808_v37 = vpop.f32.mrf.mxu1 }
 0x19b   :  { %2204 = vst [vmem:[#allocation2 + $0x1c8] sm:$0xff] %v2140_v52  ;;  %v2139_v49 = vadd.f32 %v2044_v11, %v1463_v9  ;;  %v1478_v48 = vadd.f32 %v2808_v37, %v4910_v10  ;;  %v2906_v23 = vpop.f32.mrf.mxu0 }
 0x19c   :  { %v1472_v45 = vpop.f32.mrf.mxu1 }
 0x19d   :  { %2203 = vst [vmem:[#allocation2 + $0x1c0] sm:$0xff] %v2139_v49  ;;  %v2142_v15 = vadd.f32 %v2906_v23, %v1478_v48  ;;  %v1473_v2 = vadd.f32 %v1472_v45, %v4911_v13  ;;  %v2054_v29 = vpop.f32.mrf.mxu0 }
 0x19e   :  { %v2811_v26 = vpop.f32.mrf.mxu1 }
 0x19f   :  { %2206 = vst [vmem:[#allocation2 + $0x1d8] sm:$0xff] %v2142_v15  ;;  %v2141_v5 = vadd.f32 %v2054_v29, %v1473_v2  ;;  %v1488_v38 = vadd.f32 %v2811_v26, %v4912_v57  ;;  %v2909_v28 = vpop.f32.mrf.mxu0 }
 0x1a0   :  { %v1482_v24 = vpop.f32.mrf.mxu1 }
 0x1a1   :  { %2205 = vst [vmem:[#allocation2 + $0x1d0] sm:$0xff] %v2141_v5  ;;  %v2144_v44 = vadd.f32 %v2909_v28, %v1488_v38  ;;  %v1483_v42 = vadd.f32 %v1482_v24, %v4913_v34  ;;  %v2064_v27 = vpop.f32.mrf.mxu0 }
 0x1a2   :  { %v2814_v7 = vpop.f32.mrf.mxu1 }
 0x1a3   :  { %2208 = vst [vmem:[#allocation2 + $0x1e8] sm:$0xff] %v2144_v44  ;;  %v2143_v20 = vadd.f32 %v2064_v27, %v1483_v42  ;;  %v1498_v53 = vadd.f32 %v2814_v7, %v4914_v0  ;;  %v2912_v8 = vpop.f32.mrf.mxu0 }
 0x1a4   :  { %v1492_v31 = vpop.f32.mrf.mxu1 }
 0x1a5   :  { %2207 = vst [vmem:[#allocation2 + $0x1e0] sm:$0xff] %v2143_v20  ;;  %v2146_v14 = vadd.f32 %v2912_v8, %v1498_v53  ;;  %v1493_v56 = vadd.f32 %v1492_v31, %v4915_v30  ;;  %v2074_v59 = vpop.f32.mrf.mxu0 }
 0x1a7   :  { %2210 = vst [vmem:[#allocation2 + $0x1f8] sm:$0xff] %v2146_v14  ;;  %v2145_v1 = vadd.f32 %v2074_v59, %v1493_v56 }
 0x1a9   :  { %2209 = vst [vmem:[#allocation2 + $0x1f0] sm:$0xff] %v2145_v1 }
 0x1aa   :  { %2929 = shalt.err (!%p2926_p4)
}
 0x1ab   :  { %s2941_s28 = smov 128   ;;  %s2942_s29 = smov 8  }
 0x1ac   :  { %2222 = dma.vmem_to_hbm [thread:$0]  %s2217_s1, 8192, %s4638_s2, [#allocation3], %s2941_s28, %s2941_s28, %s2942_s29  }
 0x1ad   :  { %2938 = dma.done.wait [#allocation3], 8192  }
 0x1ae   :  { %2939 = vsyncadd [#allocation3], 4294959104 }
 0x1af   :  { %2226 = vsyncpa [#allocation3], 1 }

</bundles_post_ra>
